<compile_context>
chip_gen: v6e
topology: v6e:2x2x1
jax: 0.10.0
libtpu: 0.0.40
codegen_flags: <defaults>
</compile_context>

<pallas_src>
import functools
import math

import jax
import jax.numpy as jnp
from jax.experimental import pallas as pl
from jax.experimental.pallas import tpu as pltpu

_VMEM = pl.BlockSpec(memory_space=pltpu.MemorySpace.VMEM)

_CONV_TILE_M = 8192          # lane-tile cap for conv matmuls (multiple of 128)
_HEAD_TILE_B = 8192          # lane-tile cap for the (rare) gridded-head fallback
_HEAD_FUSE_MAX_B = 32768     # below this, the whole head runs as one fused kernel
_CONV_COMPUTE_DTYPE = jnp.bfloat16   # MXU operand dtype; accumulation stays f32


@functools.lru_cache(maxsize=None)
def _scoped_vmem_limit():
    """Generation-aware scoped-VMEM limit: ~half of physical VMEM.

    128 MiB parts (v5e/v6e) -> 64 MiB; 64 MiB parts (v7x, per-TC) -> 32 MiB.
    Falls back to a conservative 32 MiB if the query is unavailable.
    """
    cap = 64 * 1024 * 1024
    try:
        cap = int(pltpu.get_tpu_info().vmem_capacity_bytes)
    except Exception:
        pass
    return int(min(max(cap // 2, 32 * 1024 * 1024), 64 * 1024 * 1024))


# ---------------------------------------------------------------------------
# Pallas kernels
# ---------------------------------------------------------------------------
def _convT_kernel(w_ref, b_ref, p_ref, o_ref):
    # w: (C_out, K) bf16   p: (K, TILE_M) bf16   b: (C_out, 1) f32
    # o: (C_out, TILE_M)  lane-dense tile; bf16 for hidden layers, f32 for the last.
    acc = jnp.dot(w_ref[...], p_ref[...], preferred_element_type=jnp.float32)
    o_ref[...] = jnp.maximum(acc + b_ref[...], 0.0).astype(o_ref.dtype)


def _kaf_mix(x, alpha_ref, gamma, dict_values):
    # x: (C, TILE_B) f32, batch on lanes.  alpha_ref: (D, C, 1) f32.
    # Dictionary values are static Python floats -> baked-in constants; the
    # D-loop is short and static, so it is unrolled; alpha is indexed on the
    # (major) D axis only -> no per-iteration lane slicing.
    y5 = jnp.zeros_like(x)
    for d, dv in enumerate(dict_values):
        diff = x - dv
        y5 = y5 + alpha_ref[d] * jnp.exp(-gamma * diff * diff)
    return y5


def _fused_head_kernel(y4_ref, alpha_ref, wl_ref, bl_ref, o_ref, *, gamma, dict_values):
    # y4: (12, B) f32 (batch on lanes)  wl: (10, 12)  bl: (10, 1)  o: (10, B) log-probs.
    # F.log_softmax(..., dim=0) normalizes over the BATCH axis, which is the
    # lane axis (axis=1) in this transposed layout.  The block covers the full
    # batch, so no padded columns exist and no masking is needed.
    y5 = _kaf_mix(y4_ref[...], alpha_ref, gamma, dict_values)
    logits = jnp.dot(wl_ref[...], y5, preferred_element_type=jnp.float32) + bl_ref[...]
    m = jnp.max(logits, axis=1, keepdims=True)
    lse = jnp.log(jnp.sum(jnp.exp(logits - m), axis=1, keepdims=True)) + m
    o_ref[...] = logits - lse


def _head_logits_kernel(y4_ref, alpha_ref, wl_ref, bl_ref, o_ref, *, gamma, dict_values):
    # Gridded fallback for very large batches: KAF + linear only (no softmax).
    y5 = _kaf_mix(y4_ref[...], alpha_ref, gamma, dict_values)
    o_ref[...] = jnp.dot(wl_ref[...], y5, preferred_element_type=jnp.float32) + bl_ref[...]


def _log_softmax_batch_kernel(lg_ref, o_ref):
    # Batch-coupled log-softmax over lanes of the full (10, B) logits.
    lg = lg_ref[...]
    m = jnp.max(lg, axis=1, keepdims=True)
    lse = jnp.log(jnp.sum(jnp.exp(lg - m), axis=1, keepdims=True)) + m
    o_ref[...] = lg - lse


# ---------------------------------------------------------------------------
# Conv layer (transposed im2col matmul, gridded over M = B*Ho*Wo)
# ---------------------------------------------------------------------------
def _im2col_T(x, k, stride, pad):
    """x: (C, B, H, W) -> patches^T of shape (C*k*k, B*Ho*Wo).

    Row order is (ci, kh, kw), matching PyTorch's weight.reshape(C_out, -1).
    Column order is (b, ho, wo), so the kernel output reshapes straight back
    to (C_out, B, Ho, Wo) with no transpose.
    """
    C, B, H, W = x.shape
    Ho = (H + 2 * pad - k) // stride + 1
    Wo = (W + 2 * pad - k) // stride + 1
    xp = jnp.pad(x, ((0, 0), (0, 0), (pad, pad), (pad, pad)))
    taps = []
    for i in range(k):
        for j in range(k):
            taps.append(xp[:, :, i:i + stride * Ho:stride, j:j + stride * Wo:stride])
    p = jnp.stack(taps, axis=1)                     # (C, k*k, B, Ho, Wo)
    return p.reshape(C * k * k, B * Ho * Wo), Ho, Wo


def conv2d_relu_t(x, w, b, *, stride=2, pad=2, out_dtype=jnp.float32):
    """x: (C_in, B, H, W); w: (C_out, C_in, k, k); b: (C_out,) -> (C_out, B, Ho, Wo)."""
    C_out, C_in, k, _ = w.shape
    _, B, H, W = x.shape

    # TODO(synk): patches are still materialized by XLA; fusing the window
    # gather into the kernel needs strided in-kernel taps that do not lower
    # reliably, so it is left as XLA glue.
    patches, Ho, Wo = _im2col_T(x.astype(_CONV_COMPUTE_DTYPE), k, stride, pad)
    K, M = patches.shape

    if M <= _CONV_TILE_M:
        tile_m = M                   # single full-extent block: always legal, no padding
    else:
        tile_m = _CONV_TILE_M        # multiple of 128; Pallas handles the ragged last block
    grid_m = pl.cdiv(M, tile_m)

    w2 = w.reshape(C_out, C_in * k * k).astype(_CONV_COMPUTE_DTYPE)   # (C_out, K)
    b2 = b.reshape(C_out, 1).astype(jnp.float32)

    out = pl.pallas_call(
        _convT_kernel,
        out_shape=jax.ShapeDtypeStruct((C_out, M), out_dtype),
        grid=(grid_m,),
        in_specs=[
            pl.BlockSpec((C_out, K), lambda m: (0, 0)),      # weights (block revisited -> resident)
            pl.BlockSpec((C_out, 1), lambda m: (0, 0)),      # bias
            pl.BlockSpec((K, tile_m), lambda m: (0, m)),     # patches tile (lane-dense)
        ],
        out_specs=pl.BlockSpec((C_out, tile_m), lambda m: (0, m)),
        compiler_params=pltpu.CompilerParams(
            dimension_semantics=("parallel",),               # shard M tiles over TCs on v7x
            vmem_limit_bytes=_scoped_vmem_limit(),
        ),
    )(w2, b2, patches)

    return out.reshape(C_out, B, Ho, Wo)


# ---------------------------------------------------------------------------
# Head: avg_pool -> KAF -> Linear -> batch-axis log_softmax (single fused kernel)
# ---------------------------------------------------------------------------
def head_forward(y3, params):
    """y3: (12, B, 4, 4) f32 -> log-probs (B, 10)."""
    C, B = y3.shape[0], y3.shape[1]
    # F.avg_pool2d(y3, 4): global 4x4 average (spatial extent is exactly 4x4).
    y4 = y3.reshape(C, B, 16).mean(axis=-1)                       # (12, B), tiny XLA op

    alpha = params["kaf_alpha"].astype(jnp.float32)               # (12, D)
    D = alpha.shape[1]
    alpha3 = alpha.T.reshape(D, C, 1)                             # static D-axis indexing in-kernel
    wl = params["wl"].astype(jnp.float32)                         # (10, 12)
    bl = params["bl"].reshape(-1, 1).astype(jnp.float32)          # (10, 1)
    n_cls = wl.shape[0]
    gamma = float(params["gamma"])
    dict_values = tuple(params["kaf_dict"])                       # static Python floats

    limit = _scoped_vmem_limit()

    if B <= _HEAD_FUSE_MAX_B:
        kern = functools.partial(_fused_head_kernel, gamma=gamma, dict_values=dict_values)
        logp = pl.pallas_call(
            kern,
            out_shape=jax.ShapeDtypeStruct((n_cls, B), jnp.float32),
            in_specs=[_VMEM, _VMEM, _VMEM, _VMEM],
            out_specs=_VMEM,
            compiler_params=pltpu.CompilerParams(vmem_limit_bytes=limit),
        )(y4, alpha3, wl, bl)
        return logp.T                                             # (B, 10)

    # Fallback for very large batches: gridded KAF+linear (ragged last block is
    # write-masked, so `logits` holds exactly B valid columns), then the
    # batch-coupled log-softmax over the full (10, B) logits in a tiny pass.
    tile_b = _HEAD_TILE_B
    kern = functools.partial(_head_logits_kernel, gamma=gamma, dict_values=dict_values)
    logits = pl.pallas_call(
        kern,
        out_shape=jax.ShapeDtypeStruct((n_cls, B), jnp.float32),
        grid=(pl.cdiv(B, tile_b),),
        in_specs=[
            pl.BlockSpec((C, tile_b), lambda t: (0, t)),
            pl.BlockSpec((D, C, 1), lambda t: (0, 0, 0)),
            pl.BlockSpec((n_cls, C), lambda t: (0, 0)),
            pl.BlockSpec((n_cls, 1), lambda t: (0, 0)),
        ],
        out_specs=pl.BlockSpec((n_cls, tile_b), lambda t: (0, t)),
        compiler_params=pltpu.CompilerParams(
            dimension_semantics=("parallel",), vmem_limit_bytes=limit),
    )(y4, alpha3, wl, bl)

    logp = pl.pallas_call(
        _log_softmax_batch_kernel,
        out_shape=jax.ShapeDtypeStruct((n_cls, B), jnp.float32),
        in_specs=[_VMEM],
        out_specs=_VMEM,
        compiler_params=pltpu.CompilerParams(vmem_limit_bytes=limit),
    )(logits)
    return logp.T                                                 # (B, 10)


# ---------------------------------------------------------------------------
# Full forward
# ---------------------------------------------------------------------------
def cnn_kaf_forward(x, params):
    x = x.reshape(-1, 1, 28, 28).astype(jnp.float32)        # x.view(-1, 1, 28, 28)
    xc = x.transpose(1, 0, 2, 3)                             # channel-major (1, B, 28, 28)
    # Hidden activations are produced directly in bf16 (the next layer's MXU
    # operands are bf16 anyway) to halve intermediate HBM traffic; the last
    # conv stays f32 because the head math is f32.
    y1 = conv2d_relu_t(xc, params["w1"], params["b1"], out_dtype=jnp.bfloat16)  # (14,B,14,14)
    y2 = conv2d_relu_t(y1, params["w2"], params["b2"], out_dtype=jnp.bfloat16)  # (14,B,7,7)
    y3 = conv2d_relu_t(y2, params["w3"], params["b3"], out_dtype=jnp.float32)   # (12,B,4,4)
    return head_forward(y3, params)                          # (B, 10) log-probs


# ---------------------------------------------------------------------------
# Deterministic parameter init (synthetic, mirrors PyTorch default fan-in bounds)
# ---------------------------------------------------------------------------
def init_params(key, D=20, boundary=4.0):
    ks = jax.random.split(key, 9)

    def uniform(k, shape, fan_in):
        bound = 1.0 / math.sqrt(fan_in)
        return jax.random.uniform(k, shape, jnp.float32, -bound, bound)

    params = {
        "w1": uniform(ks[0], (14, 1, 5, 5), 1 * 25),
        "b1": uniform(ks[1], (14,), 1 * 25),
        "w2": uniform(ks[2], (14, 14, 5, 5), 14 * 25),
        "b2": uniform(ks[3], (14,), 14 * 25),
        "w3": uniform(ks[4], (12, 14, 5, 5), 14 * 25),
        "b3": uniform(ks[5], (12,), 14 * 25),
        "wl": uniform(ks[6], (10, 12), 12),
        "bl": uniform(ks[7], (10,), 12),
    }
    # KAF: fixed Gaussian dictionary (static -> stored as Python floats and
    # baked into the kernel) + learned per-channel mixing coefficients alpha.
    step = 2.0 * boundary / (D - 1)
    params["kaf_dict"] = tuple(-boundary + step * i for i in range(D))
    params["kaf_alpha"] = 0.3 * jax.random.normal(ks[8], (12, D), jnp.float32)
    params["gamma"] = float(0.5 / (2.0 * step) ** 2)
    return params


# ---------------------------------------------------------------------------
if __name__ == "__main__":
    key = jax.random.PRNGKey(0)
    k_param, k_x = jax.random.split(key)

    params = init_params(k_param)
    x = jax.random.normal(k_x, (2, 1, 28, 28), jnp.float32)   # batch=2 MNIST-sized input

    out = jax.jit(lambda xx: cnn_kaf_forward(xx, params))(x)
    jax.block_until_ready(out)

    assert out.shape == (2, 10) and out.dtype == jnp.float32
    assert bool(jnp.all(jnp.isfinite(out)))
    print("KERNEL_OK")
</pallas_src>

<mosaic_0001>
module attributes {stable_mosaic.version = 11 : i64} {
  func.func @_convT_kernel(%arg0: i32, %arg1: memref<14x25xbf16, #tpu.memory_space<vmem>>, %arg2: memref<14x1xf32, #tpu.memory_space<vmem>>, %arg3: memref<25x392xbf16, #tpu.memory_space<vmem>>, %arg4: memref<14x392xbf16, #tpu.memory_space<vmem>>) attributes {dimension_semantics = [#tpu.dimension_semantics<parallel>], iteration_bounds = array<i64: 1>, scalar_prefetch = 0 : i64, scratch_operands = 0 : i64, tpu.core_type = #tpu.core_type<tc>, window_params = [{pipeline_mode = #tpu.pipeline_mode<synchronous>, transform_indices = @transform_0, window_bounds = array<i64: 14, 25>}, {pipeline_mode = #tpu.pipeline_mode<synchronous>, transform_indices = @transform_1, window_bounds = array<i64: 14, 1>}, {transform_indices = @transform_2, window_bounds = array<i64: 25, 392>}, {transform_indices = @transform_3, window_bounds = array<i64: 14, 392>}]} {
    %c0 = arith.constant 0 : index
    %c0_0 = arith.constant 0 : index
    %0 = vector.load %arg1[%c0, %c0_0] : memref<14x25xbf16, #tpu.memory_space<vmem>>, vector<14x25xbf16>
    %c0_1 = arith.constant 0 : index
    %c0_2 = arith.constant 0 : index
    %1 = vector.load %arg3[%c0_1, %c0_2] : memref<25x392xbf16, #tpu.memory_space<vmem>>, vector<25x392xbf16>
    %cst = arith.constant dense<0.000000e+00> : vector<14x392xf32>
    %2 = tpu.matmul %0, %1, %cst {dimension_numbers = #tpu.dot_dimension_numbers<[1], [0], [0], [1], [0, 0, 1, 1], [], []>} : vector<14x25xbf16>, vector<25x392xbf16>, vector<14x392xf32> -> vector<14x392xf32>
    %c0_3 = arith.constant 0 : index
    %c0_4 = arith.constant 0 : index
    %3 = vector.load %arg2[%c0_3, %c0_4] : memref<14x1xf32, #tpu.memory_space<vmem>>, vector<14x1xf32>
    %4 = vector.broadcast %3 : vector<14x1xf32> to vector<14x392xf32>
    %5 = arith.addf %2, %4 : vector<14x392xf32>
    %cst_5 = arith.constant 0.000000e+00 : f32
    %6 = vector.broadcast %cst_5 : f32 to vector<14x392xf32>
    %7 = arith.maximumf %5, %6 : vector<14x392xf32>
    %8 = arith.truncf %7 : vector<14x392xf32> to vector<14x392xbf16>
    %c0_6 = arith.constant 0 : index
    %c0_7 = arith.constant 0 : index
    %9 = vector.load %arg4[%c0_6, %c0_7] : memref<14x392xbf16, #tpu.memory_space<vmem>>, vector<14x392xbf16>
    tpu.vector_store %arg4[%c0_6, %c0_7], %8 {strides = array<i32>} : memref<14x392xbf16, #tpu.memory_space<vmem>>, vector<14x392xbf16>,
    return
  }
  func.func @transform_0(%arg0: i32) -> (i32, i32) {
    %c0_i32 = arith.constant 0 : i32
    %c0_i32_0 = arith.constant 0 : i32
    %c0_i32_1 = arith.constant 0 : i32
    return %c0_i32, %c0_i32_0 : i32, i32
  }
  func.func @transform_1(%arg0: i32) -> (i32, i32) {
    %c0_i32 = arith.constant 0 : i32
    %c0_i32_0 = arith.constant 0 : i32
    %c0_i32_1 = arith.constant 0 : i32
    return %c0_i32, %c0_i32_0 : i32, i32
  }
  func.func @transform_2(%arg0: i32) -> (i32, i32) {
    %c0_i32 = arith.constant 0 : i32
    %c0_i32_0 = arith.constant 0 : i32
    return %c0_i32, %arg0 : i32, i32
  }
  func.func @transform_3(%arg0: i32) -> (i32, i32) {
    %c0_i32 = arith.constant 0 : i32
    %c0_i32_0 = arith.constant 0 : i32
    return %c0_i32, %arg0 : i32, i32
  }
}

module attributes {stable_mosaic.version = 11 : i64} {
  func.func @_convT_kernel(%arg0: i32, %arg1: memref<14x350xbf16, #tpu.memory_space<vmem>>, %arg2: memref<14x1xf32, #tpu.memory_space<vmem>>, %arg3: memref<350x98xbf16, #tpu.memory_space<vmem>>, %arg4: memref<14x98xbf16, #tpu.memory_space<vmem>>) attributes {dimension_semantics = [#tpu.dimension_semantics<parallel>], iteration_bounds = array<i64: 1>, scalar_prefetch = 0 : i64, scratch_operands = 0 : i64, tpu.core_type = #tpu.core_type<tc>, window_params = [{pipeline_mode = #tpu.pipeline_mode<synchronous>, transform_indices = @transform_0, window_bounds = array<i64: 14, 350>}, {pipeline_mode = #tpu.pipeline_mode<synchronous>, transform_indices = @transform_1, window_bounds = array<i64: 14, 1>}, {transform_indices = @transform_2, window_bounds = array<i64: 350, 98>}, {transform_indices = @transform_3, window_bounds = array<i64: 14, 98>}]} {
    %c0 = arith.constant 0 : index
    %c0_0 = arith.constant 0 : index
    %0 = vector.load %arg1[%c0, %c0_0] : memref<14x350xbf16, #tpu.memory_space<vmem>>, vector<14x350xbf16>
    %c0_1 = arith.constant 0 : index
    %c0_2 = arith.constant 0 : index
    %1 = vector.load %arg3[%c0_1, %c0_2] : memref<350x98xbf16, #tpu.memory_space<vmem>>, vector<350x98xbf16>
    %cst = arith.constant dense<0.000000e+00> : vector<14x98xf32>
    %2 = tpu.matmul %0, %1, %cst {dimension_numbers = #tpu.dot_dimension_numbers<[1], [0], [0], [1], [0, 0, 1, 1], [], []>} : vector<14x350xbf16>, vector<350x98xbf16>, vector<14x98xf32> -> vector<14x98xf32>
    %c0_3 = arith.constant 0 : index
    %c0_4 = arith.constant 0 : index
    %3 = vector.load %arg2[%c0_3, %c0_4] : memref<14x1xf32, #tpu.memory_space<vmem>>, vector<14x1xf32>
    %4 = vector.broadcast %3 : vector<14x1xf32> to vector<14x98xf32>
    %5 = arith.addf %2, %4 : vector<14x98xf32>
    %cst_5 = arith.constant 0.000000e+00 : f32
    %6 = vector.broadcast %cst_5 : f32 to vector<14x98xf32>
    %7 = arith.maximumf %5, %6 : vector<14x98xf32>
    %8 = arith.truncf %7 : vector<14x98xf32> to vector<14x98xbf16>
    %c0_6 = arith.constant 0 : index
    %c0_7 = arith.constant 0 : index
    %9 = vector.load %arg4[%c0_6, %c0_7] : memref<14x98xbf16, #tpu.memory_space<vmem>>, vector<14x98xbf16>
    tpu.vector_store %arg4[%c0_6, %c0_7], %8 {strides = array<i32>} : memref<14x98xbf16, #tpu.memory_space<vmem>>, vector<14x98xbf16>,
    return
  }
  func.func @transform_0(%arg0: i32) -> (i32, i32) {
    %c0_i32 = arith.constant 0 : i32
    %c0_i32_0 = arith.constant 0 : i32
    %c0_i32_1 = arith.constant 0 : i32
    return %c0_i32, %c0_i32_0 : i32, i32
  }
  func.func @transform_1(%arg0: i32) -> (i32, i32) {
    %c0_i32 = arith.constant 0 : i32
    %c0_i32_0 = arith.constant 0 : i32
    %c0_i32_1 = arith.constant 0 : i32
    return %c0_i32, %c0_i32_0 : i32, i32
  }
  func.func @transform_2(%arg0: i32) -> (i32, i32) {
    %c0_i32 = arith.constant 0 : i32
    %c0_i32_0 = arith.constant 0 : i32
    return %c0_i32, %arg0 : i32, i32
  }
  func.func @transform_3(%arg0: i32) -> (i32, i32) {
    %c0_i32 = arith.constant 0 : i32
    %c0_i32_0 = arith.constant 0 : i32
    return %c0_i32, %arg0 : i32, i32
  }
}

module attributes {stable_mosaic.version = 11 : i64} {
  func.func @_convT_kernel(%arg0: i32, %arg1: memref<12x350xbf16, #tpu.memory_space<vmem>>, %arg2: memref<12x1xf32, #tpu.memory_space<vmem>>, %arg3: memref<350x32xbf16, #tpu.memory_space<vmem>>, %arg4: memref<12x32xf32, #tpu.memory_space<vmem>>) attributes {dimension_semantics = [#tpu.dimension_semantics<parallel>], iteration_bounds = array<i64: 1>, scalar_prefetch = 0 : i64, scratch_operands = 0 : i64, tpu.core_type = #tpu.core_type<tc>, window_params = [{pipeline_mode = #tpu.pipeline_mode<synchronous>, transform_indices = @transform_0, window_bounds = array<i64: 12, 350>}, {pipeline_mode = #tpu.pipeline_mode<synchronous>, transform_indices = @transform_1, window_bounds = array<i64: 12, 1>}, {transform_indices = @transform_2, window_bounds = array<i64: 350, 32>}, {transform_indices = @transform_3, window_bounds = array<i64: 12, 32>}]} {
    %c0 = arith.constant 0 : index
    %c0_0 = arith.constant 0 : index
    %0 = vector.load %arg1[%c0, %c0_0] : memref<12x350xbf16, #tpu.memory_space<vmem>>, vector<12x350xbf16>
    %c0_1 = arith.constant 0 : index
    %c0_2 = arith.constant 0 : index
    %1 = vector.load %arg3[%c0_1, %c0_2] : memref<350x32xbf16, #tpu.memory_space<vmem>>, vector<350x32xbf16>
    %cst = arith.constant dense<0.000000e+00> : vector<12x32xf32>
    %2 = tpu.matmul %0, %1, %cst {dimension_numbers = #tpu.dot_dimension_numbers<[1], [0], [0], [1], [0, 0, 1, 1], [], []>} : vector<12x350xbf16>, vector<350x32xbf16>, vector<12x32xf32> -> vector<12x32xf32>
    %c0_3 = arith.constant 0 : index
    %c0_4 = arith.constant 0 : index
    %3 = vector.load %arg2[%c0_3, %c0_4] : memref<12x1xf32, #tpu.memory_space<vmem>>, vector<12x1xf32>
    %4 = vector.broadcast %3 : vector<12x1xf32> to vector<12x32xf32>
    %5 = arith.addf %2, %4 : vector<12x32xf32>
    %cst_5 = arith.constant 0.000000e+00 : f32
    %6 = vector.broadcast %cst_5 : f32 to vector<12x32xf32>
    %7 = arith.maximumf %5, %6 : vector<12x32xf32>
    %c0_6 = arith.constant 0 : index
    %c0_7 = arith.constant 0 : index
    %8 = vector.load %arg4[%c0_6, %c0_7] : memref<12x32xf32, #tpu.memory_space<vmem>>, vector<12x32xf32>
    tpu.vector_store %arg4[%c0_6, %c0_7], %7 {strides = array<i32>} : memref<12x32xf32, #tpu.memory_space<vmem>>, vector<12x32xf32>,
    return
  }
  func.func @transform_0(%arg0: i32) -> (i32, i32) {
    %c0_i32 = arith.constant 0 : i32
    %c0_i32_0 = arith.constant 0 : i32
    %c0_i32_1 = arith.constant 0 : i32
    return %c0_i32, %c0_i32_0 : i32, i32
  }
  func.func @transform_1(%arg0: i32) -> (i32, i32) {
    %c0_i32 = arith.constant 0 : i32
    %c0_i32_0 = arith.constant 0 : i32
    %c0_i32_1 = arith.constant 0 : i32
    return %c0_i32, %c0_i32_0 : i32, i32
  }
  func.func @transform_2(%arg0: i32) -> (i32, i32) {
    %c0_i32 = arith.constant 0 : i32
    %c0_i32_0 = arith.constant 0 : i32
    return %c0_i32, %arg0 : i32, i32
  }
  func.func @transform_3(%arg0: i32) -> (i32, i32) {
    %c0_i32 = arith.constant 0 : i32
    %c0_i32_0 = arith.constant 0 : i32
    return %c0_i32, %arg0 : i32, i32
  }
}

module attributes {stable_mosaic.version = 11 : i64} {
  func.func @_fused_head_kernel(%arg0: memref<12x2xf32, #tpu.memory_space<vmem>>, %arg1: memref<20x12x1xf32, #tpu.memory_space<vmem>>, %arg2: memref<10x12xf32, #tpu.memory_space<vmem>>, %arg3: memref<10x1xf32, #tpu.memory_space<vmem>>, %arg4: memref<10x2xf32, #tpu.memory_space<vmem>>) attributes {dimension_semantics = [], scalar_prefetch = 0 : i64, scratch_operands = 0 : i64, tpu.core_type = #tpu.core_type<tc>} {
    %c0 = arith.constant 0 : index
    %c0_0 = arith.constant 0 : index
    %0 = vector.load %arg0[%c0, %c0_0] : memref<12x2xf32, #tpu.memory_space<vmem>>, vector<12x2xf32>
    %cst = arith.constant 0.000000e+00 : f32
    %1 = vector.broadcast %cst : f32 to vector<12x2xf32>
    %cst_1 = arith.constant -4.000000e+00 : f32
    %2 = vector.broadcast %cst_1 : f32 to vector<12x2xf32>
    %3 = arith.subf %0, %2 : vector<12x2xf32>
    %c0_2 = arith.constant 0 : index
    %c0_3 = arith.constant 0 : index
    %c0_4 = arith.constant 0 : index
    %4 = vector.load %arg1[%c0_2, %c0_3, %c0_4] : memref<20x12x1xf32, #tpu.memory_space<vmem>>, vector<1x12x1xf32>
    %5 = vector.shape_cast %4 : vector<1x12x1xf32> to vector<12x1xf32>
    %cst_5 = arith.constant -0.705078125 : f32
    %6 = vector.broadcast %cst_5 : f32 to vector<12x2xf32>
    %7 = arith.mulf %6, %3 : vector<12x2xf32>
    %8 = arith.mulf %7, %3 : vector<12x2xf32>
    %9 = math.exp %8 : vector<12x2xf32>
    %10 = vector.broadcast %5 : vector<12x1xf32> to vector<12x2xf32>
    %11 = arith.mulf %10, %9 : vector<12x2xf32>
    %12 = arith.addf %1, %11 : vector<12x2xf32>
    %cst_6 = arith.constant -3.57894731 : f32
    %13 = vector.broadcast %cst_6 : f32 to vector<12x2xf32>
    %14 = arith.subf %0, %13 : vector<12x2xf32>
    %c1 = arith.constant 1 : index
    %c0_7 = arith.constant 0 : index
    %c0_8 = arith.constant 0 : index
    %15 = vector.load %arg1[%c1, %c0_7, %c0_8] : memref<20x12x1xf32, #tpu.memory_space<vmem>>, vector<1x12x1xf32>
    %16 = vector.shape_cast %15 : vector<1x12x1xf32> to vector<12x1xf32>
    %cst_9 = arith.constant -0.705078125 : f32
    %17 = vector.broadcast %cst_9 : f32 to vector<12x2xf32>
    %18 = arith.mulf %17, %14 : vector<12x2xf32>
    %19 = arith.mulf %18, %14 : vector<12x2xf32>
    %20 = math.exp %19 : vector<12x2xf32>
    %21 = vector.broadcast %16 : vector<12x1xf32> to vector<12x2xf32>
    %22 = arith.mulf %21, %20 : vector<12x2xf32>
    %23 = arith.addf %12, %22 : vector<12x2xf32>
    %cst_10 = arith.constant -3.15789485 : f32
    %24 = vector.broadcast %cst_10 : f32 to vector<12x2xf32>
    %25 = arith.subf %0, %24 : vector<12x2xf32>
    %c2 = arith.constant 2 : index
    %c0_11 = arith.constant 0 : index
    %c0_12 = arith.constant 0 : index
    %26 = vector.load %arg1[%c2, %c0_11, %c0_12] : memref<20x12x1xf32, #tpu.memory_space<vmem>>, vector<1x12x1xf32>
    %27 = vector.shape_cast %26 : vector<1x12x1xf32> to vector<12x1xf32>
    %cst_13 = arith.constant -0.705078125 : f32
    %28 = vector.broadcast %cst_13 : f32 to vector<12x2xf32>
    %29 = arith.mulf %28, %25 : vector<12x2xf32>
    %30 = arith.mulf %29, %25 : vector<12x2xf32>
    %31 = math.exp %30 : vector<12x2xf32>
    %32 = vector.broadcast %27 : vector<12x1xf32> to vector<12x2xf32>
    %33 = arith.mulf %32, %31 : vector<12x2xf32>
    %34 = arith.addf %23, %33 : vector<12x2xf32>
    %cst_14 = arith.constant -2.73684216 : f32
    %35 = vector.broadcast %cst_14 : f32 to vector<12x2xf32>
    %36 = arith.subf %0, %35 : vector<12x2xf32>
    %c3 = arith.constant 3 : index
    %c0_15 = arith.constant 0 : index
    %c0_16 = arith.constant 0 : index
    %37 = vector.load %arg1[%c3, %c0_15, %c0_16] : memref<20x12x1xf32, #tpu.memory_space<vmem>>, vector<1x12x1xf32>
    %38 = vector.shape_cast %37 : vector<1x12x1xf32> to vector<12x1xf32>
    %cst_17 = arith.constant -0.705078125 : f32
    %39 = vector.broadcast %cst_17 : f32 to vector<12x2xf32>
    %40 = arith.mulf %39, %36 : vector<12x2xf32>
    %41 = arith.mulf %40, %36 : vector<12x2xf32>
    %42 = math.exp %41 : vector<12x2xf32>
    %43 = vector.broadcast %38 : vector<12x1xf32> to vector<12x2xf32>
    %44 = arith.mulf %43, %42 : vector<12x2xf32>
    %45 = arith.addf %34, %44 : vector<12x2xf32>
    %cst_18 = arith.constant -2.31578946 : f32
    %46 = vector.broadcast %cst_18 : f32 to vector<12x2xf32>
    %47 = arith.subf %0, %46 : vector<12x2xf32>
    %c4 = arith.constant 4 : index
    %c0_19 = arith.constant 0 : index
    %c0_20 = arith.constant 0 : index
    %48 = vector.load %arg1[%c4, %c0_19, %c0_20] : memref<20x12x1xf32, #tpu.memory_space<vmem>>, vector<1x12x1xf32>
    %49 = vector.shape_cast %48 : vector<1x12x1xf32> to vector<12x1xf32>
    %cst_21 = arith.constant -0.705078125 : f32
    %50 = vector.broadcast %cst_21 : f32 to vector<12x2xf32>
    %51 = arith.mulf %50, %47 : vector<12x2xf32>
    %52 = arith.mulf %51, %47 : vector<12x2xf32>
    %53 = math.exp %52 : vector<12x2xf32>
    %54 = vector.broadcast %49 : vector<12x1xf32> to vector<12x2xf32>
    %55 = arith.mulf %54, %53 : vector<12x2xf32>
    %56 = arith.addf %45, %55 : vector<12x2xf32>
    %cst_22 = arith.constant -1.89473689 : f32
    %57 = vector.broadcast %cst_22 : f32 to vector<12x2xf32>
    %58 = arith.subf %0, %57 : vector<12x2xf32>
    %c5 = arith.constant 5 : index
    %c0_23 = arith.constant 0 : index
    %c0_24 = arith.constant 0 : index
    %59 = vector.load %arg1[%c5, %c0_23, %c0_24] : memref<20x12x1xf32, #tpu.memory_space<vmem>>, vector<1x12x1xf32>
    %60 = vector.shape_cast %59 : vector<1x12x1xf32> to vector<12x1xf32>
    %cst_25 = arith.constant -0.705078125 : f32
    %61 = vector.broadcast %cst_25 : f32 to vector<12x2xf32>
    %62 = arith.mulf %61, %58 : vector<12x2xf32>
    %63 = arith.mulf %62, %58 : vector<12x2xf32>
    %64 = math.exp %63 : vector<12x2xf32>
    %65 = vector.broadcast %60 : vector<12x1xf32> to vector<12x2xf32>
    %66 = arith.mulf %65, %64 : vector<12x2xf32>
    %67 = arith.addf %56, %66 : vector<12x2xf32>
    %cst_26 = arith.constant -1.47368419 : f32
    %68 = vector.broadcast %cst_26 : f32 to vector<12x2xf32>
    %69 = arith.subf %0, %68 : vector<12x2xf32>
    %c6 = arith.constant 6 : index
    %c0_27 = arith.constant 0 : index
    %c0_28 = arith.constant 0 : index
    %70 = vector.load %arg1[%c6, %c0_27, %c0_28] : memref<20x12x1xf32, #tpu.memory_space<vmem>>, vector<1x12x1xf32>
    %71 = vector.shape_cast %70 : vector<1x12x1xf32> to vector<12x1xf32>
    %cst_29 = arith.constant -0.705078125 : f32
    %72 = vector.broadcast %cst_29 : f32 to vector<12x2xf32>
    %73 = arith.mulf %72, %69 : vector<12x2xf32>
    %74 = arith.mulf %73, %69 : vector<12x2xf32>
    %75 = math.exp %74 : vector<12x2xf32>
    %76 = vector.broadcast %71 : vector<12x1xf32> to vector<12x2xf32>
    %77 = arith.mulf %76, %75 : vector<12x2xf32>
    %78 = arith.addf %67, %77 : vector<12x2xf32>
    %cst_30 = arith.constant -1.05263162 : f32
    %79 = vector.broadcast %cst_30 : f32 to vector<12x2xf32>
    %80 = arith.subf %0, %79 : vector<12x2xf32>
    %c7 = arith.constant 7 : index
    %c0_31 = arith.constant 0 : index
    %c0_32 = arith.constant 0 : index
    %81 = vector.load %arg1[%c7, %c0_31, %c0_32] : memref<20x12x1xf32, #tpu.memory_space<vmem>>, vector<1x12x1xf32>
    %82 = vector.shape_cast %81 : vector<1x12x1xf32> to vector<12x1xf32>
    %cst_33 = arith.constant -0.705078125 : f32
    %83 = vector.broadcast %cst_33 : f32 to vector<12x2xf32>
    %84 = arith.mulf %83, %80 : vector<12x2xf32>
    %85 = arith.mulf %84, %80 : vector<12x2xf32>
    %86 = math.exp %85 : vector<12x2xf32>
    %87 = vector.broadcast %82 : vector<12x1xf32> to vector<12x2xf32>
    %88 = arith.mulf %87, %86 : vector<12x2xf32>
    %89 = arith.addf %78, %88 : vector<12x2xf32>
    %cst_34 = arith.constant -0.631578922 : f32
    %90 = vector.broadcast %cst_34 : f32 to vector<12x2xf32>
    %91 = arith.subf %0, %90 : vector<12x2xf32>
    %c8 = arith.constant 8 : index
    %c0_35 = arith.constant 0 : index
    %c0_36 = arith.constant 0 : index
    %92 = vector.load %arg1[%c8, %c0_35, %c0_36] : memref<20x12x1xf32, #tpu.memory_space<vmem>>, vector<1x12x1xf32>
    %93 = vector.shape_cast %92 : vector<1x12x1xf32> to vector<12x1xf32>
    %cst_37 = arith.constant -0.705078125 : f32
    %94 = vector.broadcast %cst_37 : f32 to vector<12x2xf32>
    %95 = arith.mulf %94, %91 : vector<12x2xf32>
    %96 = arith.mulf %95, %91 : vector<12x2xf32>
    %97 = math.exp %96 : vector<12x2xf32>
    %98 = vector.broadcast %93 : vector<12x1xf32> to vector<12x2xf32>
    %99 = arith.mulf %98, %97 : vector<12x2xf32>
    %100 = arith.addf %89, %99 : vector<12x2xf32>
    %cst_38 = arith.constant -0.210526317 : f32
    %101 = vector.broadcast %cst_38 : f32 to vector<12x2xf32>
    %102 = arith.subf %0, %101 : vector<12x2xf32>
    %c9 = arith.constant 9 : index
    %c0_39 = arith.constant 0 : index
    %c0_40 = arith.constant 0 : index
    %103 = vector.load %arg1[%c9, %c0_39, %c0_40] : memref<20x12x1xf32, #tpu.memory_space<vmem>>, vector<1x12x1xf32>
    %104 = vector.shape_cast %103 : vector<1x12x1xf32> to vector<12x1xf32>
    %cst_41 = arith.constant -0.705078125 : f32
    %105 = vector.broadcast %cst_41 : f32 to vector<12x2xf32>
    %106 = arith.mulf %105, %102 : vector<12x2xf32>
    %107 = arith.mulf %106, %102 : vector<12x2xf32>
    %108 = math.exp %107 : vector<12x2xf32>
    %109 = vector.broadcast %104 : vector<12x1xf32> to vector<12x2xf32>
    %110 = arith.mulf %109, %108 : vector<12x2xf32>
    %111 = arith.addf %100, %110 : vector<12x2xf32>
    %cst_42 = arith.constant 0.210526317 : f32
    %112 = vector.broadcast %cst_42 : f32 to vector<12x2xf32>
    %113 = arith.subf %0, %112 : vector<12x2xf32>
    %c10 = arith.constant 10 : index
    %c0_43 = arith.constant 0 : index
    %c0_44 = arith.constant 0 : index
    %114 = vector.load %arg1[%c10, %c0_43, %c0_44] : memref<20x12x1xf32, #tpu.memory_space<vmem>>, vector<1x12x1xf32>
    %115 = vector.shape_cast %114 : vector<1x12x1xf32> to vector<12x1xf32>
    %cst_45 = arith.constant -0.705078125 : f32
    %116 = vector.broadcast %cst_45 : f32 to vector<12x2xf32>
    %117 = arith.mulf %116, %113 : vector<12x2xf32>
    %118 = arith.mulf %117, %113 : vector<12x2xf32>
    %119 = math.exp %118 : vector<12x2xf32>
    %120 = vector.broadcast %115 : vector<12x1xf32> to vector<12x2xf32>
    %121 = arith.mulf %120, %119 : vector<12x2xf32>
    %122 = arith.addf %111, %121 : vector<12x2xf32>
    %cst_46 = arith.constant 0.631578922 : f32
    %123 = vector.broadcast %cst_46 : f32 to vector<12x2xf32>
    %124 = arith.subf %0, %123 : vector<12x2xf32>
    %c11 = arith.constant 11 : index
    %c0_47 = arith.constant 0 : index
    %c0_48 = arith.constant 0 : index
    %125 = vector.load %arg1[%c11, %c0_47, %c0_48] : memref<20x12x1xf32, #tpu.memory_space<vmem>>, vector<1x12x1xf32>
    %126 = vector.shape_cast %125 : vector<1x12x1xf32> to vector<12x1xf32>
    %cst_49 = arith.constant -0.705078125 : f32
    %127 = vector.broadcast %cst_49 : f32 to vector<12x2xf32>
    %128 = arith.mulf %127, %124 : vector<12x2xf32>
    %129 = arith.mulf %128, %124 : vector<12x2xf32>
    %130 = math.exp %129 : vector<12x2xf32>
    %131 = vector.broadcast %126 : vector<12x1xf32> to vector<12x2xf32>
    %132 = arith.mulf %131, %130 : vector<12x2xf32>
    %133 = arith.addf %122, %132 : vector<12x2xf32>
    %cst_50 = arith.constant 1.05263162 : f32
    %134 = vector.broadcast %cst_50 : f32 to vector<12x2xf32>
    %135 = arith.subf %0, %134 : vector<12x2xf32>
    %c12 = arith.constant 12 : index
    %c0_51 = arith.constant 0 : index
    %c0_52 = arith.constant 0 : index
    %136 = vector.load %arg1[%c12, %c0_51, %c0_52] : memref<20x12x1xf32, #tpu.memory_space<vmem>>, vector<1x12x1xf32>
    %137 = vector.shape_cast %136 : vector<1x12x1xf32> to vector<12x1xf32>
    %cst_53 = arith.constant -0.705078125 : f32
    %138 = vector.broadcast %cst_53 : f32 to vector<12x2xf32>
    %139 = arith.mulf %138, %135 : vector<12x2xf32>
    %140 = arith.mulf %139, %135 : vector<12x2xf32>
    %141 = math.exp %140 : vector<12x2xf32>
    %142 = vector.broadcast %137 : vector<12x1xf32> to vector<12x2xf32>
    %143 = arith.mulf %142, %141 : vector<12x2xf32>
    %144 = arith.addf %133, %143 : vector<12x2xf32>
    %cst_54 = arith.constant 1.47368419 : f32
    %145 = vector.broadcast %cst_54 : f32 to vector<12x2xf32>
    %146 = arith.subf %0, %145 : vector<12x2xf32>
    %c13 = arith.constant 13 : index
    %c0_55 = arith.constant 0 : index
    %c0_56 = arith.constant 0 : index
    %147 = vector.load %arg1[%c13, %c0_55, %c0_56] : memref<20x12x1xf32, #tpu.memory_space<vmem>>, vector<1x12x1xf32>
    %148 = vector.shape_cast %147 : vector<1x12x1xf32> to vector<12x1xf32>
    %cst_57 = arith.constant -0.705078125 : f32
    %149 = vector.broadcast %cst_57 : f32 to vector<12x2xf32>
    %150 = arith.mulf %149, %146 : vector<12x2xf32>
    %151 = arith.mulf %150, %146 : vector<12x2xf32>
    %152 = math.exp %151 : vector<12x2xf32>
    %153 = vector.broadcast %148 : vector<12x1xf32> to vector<12x2xf32>
    %154 = arith.mulf %153, %152 : vector<12x2xf32>
    %155 = arith.addf %144, %154 : vector<12x2xf32>
    %cst_58 = arith.constant 1.89473689 : f32
    %156 = vector.broadcast %cst_58 : f32 to vector<12x2xf32>
    %157 = arith.subf %0, %156 : vector<12x2xf32>
    %c14 = arith.constant 14 : index
    %c0_59 = arith.constant 0 : index
    %c0_60 = arith.constant 0 : index
    %158 = vector.load %arg1[%c14, %c0_59, %c0_60] : memref<20x12x1xf32, #tpu.memory_space<vmem>>, vector<1x12x1xf32>
    %159 = vector.shape_cast %158 : vector<1x12x1xf32> to vector<12x1xf32>
    %cst_61 = arith.constant -0.705078125 : f32
    %160 = vector.broadcast %cst_61 : f32 to vector<12x2xf32>
    %161 = arith.mulf %160, %157 : vector<12x2xf32>
    %162 = arith.mulf %161, %157 : vector<12x2xf32>
    %163 = math.exp %162 : vector<12x2xf32>
    %164 = vector.broadcast %159 : vector<12x1xf32> to vector<12x2xf32>
    %165 = arith.mulf %164, %163 : vector<12x2xf32>
    %166 = arith.addf %155, %165 : vector<12x2xf32>
    %cst_62 = arith.constant 2.31578946 : f32
    %167 = vector.broadcast %cst_62 : f32 to vector<12x2xf32>
    %168 = arith.subf %0, %167 : vector<12x2xf32>
    %c15 = arith.constant 15 : index
    %c0_63 = arith.constant 0 : index
    %c0_64 = arith.constant 0 : index
    %169 = vector.load %arg1[%c15, %c0_63, %c0_64] : memref<20x12x1xf32, #tpu.memory_space<vmem>>, vector<1x12x1xf32>
    %170 = vector.shape_cast %169 : vector<1x12x1xf32> to vector<12x1xf32>
    %cst_65 = arith.constant -0.705078125 : f32
    %171 = vector.broadcast %cst_65 : f32 to vector<12x2xf32>
    %172 = arith.mulf %171, %168 : vector<12x2xf32>
    %173 = arith.mulf %172, %168 : vector<12x2xf32>
    %174 = math.exp %173 : vector<12x2xf32>
    %175 = vector.broadcast %170 : vector<12x1xf32> to vector<12x2xf32>
    %176 = arith.mulf %175, %174 : vector<12x2xf32>
    %177 = arith.addf %166, %176 : vector<12x2xf32>
    %cst_66 = arith.constant 2.73684216 : f32
    %178 = vector.broadcast %cst_66 : f32 to vector<12x2xf32>
    %179 = arith.subf %0, %178 : vector<12x2xf32>
    %c16 = arith.constant 16 : index
    %c0_67 = arith.constant 0 : index
    %c0_68 = arith.constant 0 : index
    %180 = vector.load %arg1[%c16, %c0_67, %c0_68] : memref<20x12x1xf32, #tpu.memory_space<vmem>>, vector<1x12x1xf32>
    %181 = vector.shape_cast %180 : vector<1x12x1xf32> to vector<12x1xf32>
    %cst_69 = arith.constant -0.705078125 : f32
    %182 = vector.broadcast %cst_69 : f32 to vector<12x2xf32>
    %183 = arith.mulf %182, %179 : vector<12x2xf32>
    %184 = arith.mulf %183, %179 : vector<12x2xf32>
    %185 = math.exp %184 : vector<12x2xf32>
    %186 = vector.broadcast %181 : vector<12x1xf32> to vector<12x2xf32>
    %187 = arith.mulf %186, %185 : vector<12x2xf32>
    %188 = arith.addf %177, %187 : vector<12x2xf32>
    %cst_70 = arith.constant 3.15789485 : f32
    %189 = vector.broadcast %cst_70 : f32 to vector<12x2xf32>
    %190 = arith.subf %0, %189 : vector<12x2xf32>
    %c17 = arith.constant 17 : index
    %c0_71 = arith.constant 0 : index
    %c0_72 = arith.constant 0 : index
    %191 = vector.load %arg1[%c17, %c0_71, %c0_72] : memref<20x12x1xf32, #tpu.memory_space<vmem>>, vector<1x12x1xf32>
    %192 = vector.shape_cast %191 : vector<1x12x1xf32> to vector<12x1xf32>
    %cst_73 = arith.constant -0.705078125 : f32
    %193 = vector.broadcast %cst_73 : f32 to vector<12x2xf32>
    %194 = arith.mulf %193, %190 : vector<12x2xf32>
    %195 = arith.mulf %194, %190 : vector<12x2xf32>
    %196 = math.exp %195 : vector<12x2xf32>
    %197 = vector.broadcast %192 : vector<12x1xf32> to vector<12x2xf32>
    %198 = arith.mulf %197, %196 : vector<12x2xf32>
    %199 = arith.addf %188, %198 : vector<12x2xf32>
    %cst_74 = arith.constant 3.57894731 : f32
    %200 = vector.broadcast %cst_74 : f32 to vector<12x2xf32>
    %201 = arith.subf %0, %200 : vector<12x2xf32>
    %c18 = arith.constant 18 : index
    %c0_75 = arith.constant 0 : index
    %c0_76 = arith.constant 0 : index
    %202 = vector.load %arg1[%c18, %c0_75, %c0_76] : memref<20x12x1xf32, #tpu.memory_space<vmem>>, vector<1x12x1xf32>
    %203 = vector.shape_cast %202 : vector<1x12x1xf32> to vector<12x1xf32>
    %cst_77 = arith.constant -0.705078125 : f32
    %204 = vector.broadcast %cst_77 : f32 to vector<12x2xf32>
    %205 = arith.mulf %204, %201 : vector<12x2xf32>
    %206 = arith.mulf %205, %201 : vector<12x2xf32>
    %207 = math.exp %206 : vector<12x2xf32>
    %208 = vector.broadcast %203 : vector<12x1xf32> to vector<12x2xf32>
    %209 = arith.mulf %208, %207 : vector<12x2xf32>
    %210 = arith.addf %199, %209 : vector<12x2xf32>
    %cst_78 = arith.constant 4.000000e+00 : f32
    %211 = vector.broadcast %cst_78 : f32 to vector<12x2xf32>
    %212 = arith.subf %0, %211 : vector<12x2xf32>
    %c19 = arith.constant 19 : index
    %c0_79 = arith.constant 0 : index
    %c0_80 = arith.constant 0 : index
    %213 = vector.load %arg1[%c19, %c0_79, %c0_80] : memref<20x12x1xf32, #tpu.memory_space<vmem>>, vector<1x12x1xf32>
    %214 = vector.shape_cast %213 : vector<1x12x1xf32> to vector<12x1xf32>
    %cst_81 = arith.constant -0.705078125 : f32
    %215 = vector.broadcast %cst_81 : f32 to vector<12x2xf32>
    %216 = arith.mulf %215, %212 : vector<12x2xf32>
    %217 = arith.mulf %216, %212 : vector<12x2xf32>
    %218 = math.exp %217 : vector<12x2xf32>
    %219 = vector.broadcast %214 : vector<12x1xf32> to vector<12x2xf32>
    %220 = arith.mulf %219, %218 : vector<12x2xf32>
    %221 = arith.addf %210, %220 : vector<12x2xf32>
    %c0_82 = arith.constant 0 : index
    %c0_83 = arith.constant 0 : index
    %222 = vector.load %arg2[%c0_82, %c0_83] : memref<10x12xf32, #tpu.memory_space<vmem>>, vector<10x12xf32>
    %cst_84 = arith.constant dense<0.000000e+00> : vector<10x2xf32>
    %223 = tpu.matmul %222, %221, %cst_84 {dimension_numbers = #tpu.dot_dimension_numbers<[1], [0], [0], [1], [0, 0, 1, 1], [], []>} : vector<10x12xf32>, vector<12x2xf32>, vector<10x2xf32> -> vector<10x2xf32>
    %c0_85 = arith.constant 0 : index
    %c0_86 = arith.constant 0 : index
    %224 = vector.load %arg3[%c0_85, %c0_86] : memref<10x1xf32, #tpu.memory_space<vmem>>, vector<10x1xf32>
    %225 = vector.broadcast %224 : vector<10x1xf32> to vector<10x2xf32>
    %226 = arith.addf %223, %225 : vector<10x2xf32>
    %cst_87 = arith.constant dense<0xFF800000> : vector<10xf32>
    %227 = vector.multi_reduction <maximumf>, %226, %cst_87 [1] : vector<10x2xf32> to vector<10xf32>
    %228 = vector.shape_cast %227 : vector<10xf32> to vector<10x1xf32>
    %229 = vector.broadcast %228 : vector<10x1xf32> to vector<10x2xf32>
    %230 = arith.subf %226, %229 : vector<10x2xf32>
    %231 = math.exp %230 : vector<10x2xf32>
    %cst_88 = arith.constant dense<0.000000e+00> : vector<10xf32>
    %232 = vector.multi_reduction <add>, %231, %cst_88 [1] : vector<10x2xf32> to vector<10xf32>
    %233 = vector.shape_cast %232 : vector<10xf32> to vector<10x1xf32>
    %234 = math.log %233 : vector<10x1xf32>
    %235 = arith.addf %234, %228 : vector<10x1xf32>
    %236 = vector.broadcast %235 : vector<10x1xf32> to vector<10x2xf32>
    %237 = arith.subf %226, %236 : vector<10x2xf32>
    %c0_89 = arith.constant 0 : index
    %c0_90 = arith.constant 0 : index
    %238 = vector.load %arg4[%c0_89, %c0_90] : memref<10x2xf32, #tpu.memory_space<vmem>>, vector<10x2xf32>
    tpu.vector_store %arg4[%c0_89, %c0_90], %237 {strides = array<i32>} : memref<10x2xf32, #tpu.memory_space<vmem>>, vector<10x2xf32>,
    return
  }
}

</mosaic_0001>

<bundles_post_ra>
// kernel: _lambda_.4
= control target key start
LH: loop header
LB: loop body
LE: loop exit
PB: predicated region body
PF: predicated region fallthrough
CT: control target
= control target key end

     0   :  { %8 = vsyncpa [#allocation3], 0  ;;  %s416_s0 = inlined_call_operand.hbm [shape: bf16[14,25], index: 0, kind: input, shape index: {}]   ;;  %s417_s1 = inlined_call_operand.hbm [shape: f32[14,1], index: 1, kind: input, shape index: {}]   ;;  %s418_s2 = inlined_call_operand.vmem [shape: bf16[25,392], index: 2, kind: input, shape index: {}]   ;;  %s419_s3 = inlined_call_operand.vmem [shape: bf16[14,392], index: 3, kind: output, shape index: {}]  }
   0x1   :  { %9 = vsyncpa [#allocation5], 0  ;;  %s344_s12 = smov [#allocation2]  }
   0x2   :  { %s15_s13 = sshll.u32 %s344_s12, 4  ;;  %s16_s13 = int_to_ptr.vmem [resolvable:$true] %s15_s13 }
   0x3   :  { %s308_s14 = scalar_lea.vmem %s16_s13, 128  ;;  %p313_p1 = scmp.lt.s32.totalorder %s16_s13, %s16_s13 }
   0x4   :  { %p309_p0 = scmp.ne.s32.totalorder %s16_s13, %s308_s14  ;;  %p314_p2 = scmp.lt.s32.totalorder %s308_s14, %s308_s14 }
   0x6   :  { %p315_p3 = por %p314_p2, %p313_p1 }
   0x8   :  { %p316_p4 = pnand %p315_p3, %p309_p0 }
   0xa   :  { %319 = shalt.err (!%p316_p4)
}
   0xb   :  { %s345_s15 = smov 64   ;;  %s346_s16 = smov 4  }
   0xc   :  { %21 = dma.hbm_to_vmem [thread:$0]  %s416_s0, 128, %s16_s13, [#allocation3], %s345_s15, %s345_s15, %s346_s16  }
   0xd   :  { %s347_s19 = smov [#allocation4]  }
   0xe   :  { %s27_s20 = sshll.u32 %s347_s19, 4  ;;  %s28_s20 = int_to_ptr.vmem [resolvable:$true] %s27_s20 }
   0xf   :  { %s328_s21 = scalar_lea.vmem %s28_s20, 256  ;;  %p333_p6 = scmp.lt.s32.totalorder %s28_s20, %s28_s20 }
  0x10   :  { %p329_p5 = scmp.ne.s32.totalorder %s28_s20, %s328_s21  ;;  %p334_p7 = scmp.lt.s32.totalorder %s328_s21, %s328_s21 }
  0x12   :  { %p335_p8 = por %p334_p7, %p333_p6 }
  0x14   :  { %p336_p9 = pnand %p335_p8, %p329_p5 }
  0x16   :  { %339 = shalt.err (!%p336_p9)
}
  0x17   :  { %s348_s22 = smov 128   ;;  %s349_s23 = smov 8  }
  0x18   :  { %33 = dma.hbm_to_vmem [thread:$0]  %s417_s1, 256, %s28_s20, [#allocation5], %s348_s22, %s348_s22, %s349_s23  }
  0x19   :  { %340 = dma.done.wait [#allocation3], 128  }
  0x1a   :  { %341 = vsyncadd [#allocation3], 4294967168 }
  0x1b   :  { %342 = dma.done.wait [#allocation5], 256  }
  0x1c   :  { %343 = vsyncadd [#allocation5], 4294967040  ;;  %vm110_vm0 = vcmask 1043456   ;;  %v350_v0 = vmov 0   ;;  %vm111_vm1 = vcmask 1044480   ;;  %v351_v1 = vmov 65535  }
  0x1d   :  { %158 = vmatprep.mubr.bf16.mxu0 %v350_v0  ;;  %201 = vmatprep.mubr.bf16.mxu1 %v350_v0  ;;  %v112_v2 = vsel %vm110_vm0, 4294967295, %v351_v1  ;;  %v287_v4 = vld [vmem:[%s418_s2 + $0x24] ss:$16 sps:$4 sm:$0x1f]   ;;  %v295_v13 = vld [vmem:[%s418_s2 + $0xc] ss:$16 sps:$4 sm:$0xff]  }
  0x1e   :  { %286 = vset.pattern.permute.xlu0 %v350_v0  ;;  %v113_v3 = vsel %vm111_vm1, %v112_v2, 0  ;;  %v289_v5 = vld [vmem:[%s418_s2 + $0x2c] ss:$16 sps:$4 sm:$0x1f]   ;;  %v293_v10 = vld [vmem:[%s418_s2 + $0x4] ss:$16 sps:$4 sm:$0xff]  }
  0x1f   :  { %v118_v6 = vand.u32 %v287_v4, %v113_v3  ;;  %v291_v7 = vld [vmem:[%s418_s2 + $0x20] ss:$16 sps:$4 sm:$0x1f]   ;;  %v292_v8 = vld [vmem:[%s418_s2 + $0x28] ss:$16 sps:$4 sm:$0x1f]   ;;  %v124_v9 = vand.u32 %v289_v5, %v113_v3 }
  0x20   :  { %v115_v11 = vand.u32 %v291_v7, %v113_v3  ;;  %v121_v12 = vand.u32 %v292_v8, %v113_v3  ;;  %v297_v14 = vld [vmem:[%s418_s2] ss:$16 sps:$4 sm:$0xff]   ;;  %v298_v15 = vld [vmem:[%s418_s2 + $0x8] ss:$16 sps:$4 sm:$0xff]   ;;  %vm106_vm2 = vcmask 203776   ;;  %vm245_vm3 = vcmask 64516  }
  0x21   :  { %138 = vmatprep.subr.bf16.mxu0 %v118_v6  ;;  %181 = vmatprep.subr.bf16.mxu1 %v124_v9  ;;  %v53_v16 = vld [vmem:[#allocation4] sm:$0xff]  ;;  %v299_v17 = vld [vmem:[#allocation2] sm:$0x7f]   ;;  %v54_v18 = vld [vmem:[#allocation4 + $0x8] sm:$0x3f]  ;;  %vm249_vm5 = vcmask 1042432  }
  0x22   :  { %139 = vmatpush1.bf16.msra.mxu0 %v115_v11  ;;  %182 = vmatpush1.bf16.msra.mxu1 %v121_v12  ;;  %vm246_vm4 = vmor %vm245_vm3, %vm110_vm0  ;;  %vm250_vm6 = vcmask 63492  }
  0x23   :  { %140 = vmatprep.subr.bf16.mxu0 %v293_v10  ;;  %183 = vmatprep.subr.bf16.mxu1 %v295_v13  ;;  %vm251_vm7 = vmor %vm250_vm6, %vm249_vm5 }
  0x24   :  { %57 = vperm.xlu0 %286, %v53_v16  }
  0x26   :  { %141 = vmatpush1.bf16.msra.mxu0 %v297_v14  ;;  %184 = vmatpush1.bf16.msra.mxu1 %v298_v15 }
  0x28   :  { %62 = vperm.xlu0 %286, %v54_v18  }
  0x29   :  { %268 = vmatmul.mubr.msk.bf16.vlgmr.msra.gmra.mxu0 %vm106_vm2, %v299_v17  ;;  %269 = vmatmul.mubr.msk.bf16.vlgmr.msra.gmra.mxu1 %vm106_vm2, %v299_v17 }
  0x9f   :  { %v58_v19 = vpop.permute.xlu0 %57 }
  0xa3   :  { %v63_v32 = vpop.permute.xlu0 %62 }
  0xe9   :  { %v160_v20 = vpop.f32.mrf.mxu0  ;;  %v203_v21 = vpop.f32.mrf.mxu1 }
  0xea   :  { %v161_v22 = vadd.f32 %v160_v20, %v58_v19  ;;  %v204_v23 = vadd.f32 %v203_v21, %v58_v19 }
  0xeb   :  { %v162_v24 = vpop.f32.mrf.mxu0  ;;  %v205_v25 = vpop.f32.mrf.mxu1 }
  0xec   :  { %v163_v26 = vadd.f32 %v162_v24, %v58_v19  ;;  %v206_v27 = vadd.f32 %v205_v25, %v58_v19  ;;  %v212_v30 = vmax.f32 %v161_v22, 0.0  ;;  %v214_v31 = vmax.f32 %v204_v23, 0.0 }
  0xed   :  { %v164_v28 = vpop.f32.mrf.mxu0  ;;  %v207_v29 = vpop.f32.mrf.mxu1 }
  0xee   :  { %v213_v33 = vmax.f32 %v163_v26, 0.0  ;;  %v215_v34 = vmax.f32 %v206_v27, 0.0  ;;  %v165_v35 = vadd.f32 %v164_v28, %v63_v32  ;;  %v208_v36 = vadd.f32 %v207_v29, %v63_v32 }
  0xef   :  { %v166_v37 = vpop.f32.mrf.mxu0  ;;  %v209_v38 = vpop.f32.mrf.mxu1 }
  0xf0   :  { %v274_v39 = vpack.c.bf16 %v213_v33, %v212_v30  ;;  %v275_v40 = vpack.c.bf16 %v215_v34, %v214_v31  ;;  %v167_v41 = vadd.f32 %v166_v37, %v63_v32  ;;  %v210_v42 = vadd.f32 %v209_v38, %v63_v32 }
  0xf1   :  { %v216_v43 = vmax.f32 %v165_v35, 0.0  ;;  %v218_v44 = vmax.f32 %v208_v36, 0.0 }
  0xf2   :  { %244 = vst [vmem:[%s419_s3] sm:$0xff] %v274_v39  ;;  %247 = vst.msk [vmem:[%s419_s3 + $0x8] sm:$0xff] %vm246_vm4, %v275_v40  ;;  %v217_v45 = vmax.f32 %v167_v41, 0.0  ;;  %v219_v46 = vmax.f32 %v210_v42, 0.0 }
  0xf4   :  { %v276_v47 = vpack.c.bf16 %v217_v45, %v216_v43  ;;  %v277_v48 = vpack.c.bf16 %v219_v46, %v218_v44 }
  0xf6   :  { %248 = vst [vmem:[%s419_s3 + $0x10] sm:$0x77] %v276_v47  ;;  %252 = vst.msk [vmem:[%s419_s3 + $0x18] sm:$0x77] %vm251_vm7, %v277_v48 }
  0xf7   :  { %257 = vsyncpa [#allocation3], 1 }
  0xf8   :  { %258 = vsyncpa [#allocation5], 1 }

// kernel: _lambda_.5
= control target key start
LH: loop header
LB: loop body
LE: loop exit
PB: predicated region body
PF: predicated region fallthrough
CT: control target
= control target key end

     0   :  { %v434_v1 = vmov 0.0   ;;  %vm435_vm0 = vmmov 0   ;;  %v436_v3 = vmov 0   ;;  %vm225_vm1 = vcmask 1046528   ;;  %s544_s2 = inlined_call_operand.vmem [shape: bf16[350,98], index: 2, kind: input, shape index: {}]   ;;  %s545_s0 = inlined_call_operand.vmem [shape: bf16[14,350], index: 0, kind: input, shape index: {}]   ;;  %s546_s1 = inlined_call_operand.vmem [shape: f32[14,1], index: 1, kind: input, shape index: {}]   ;;  %s547_s3 = inlined_call_operand.vmem [shape: bf16[14,98], index: 3, kind: output, shape index: {}]  }
   0x1   :  { %v408_v0 = vld [vmem:[%s544_s2 + $0x78] sm:$0xff]   ;;  %388 = vmatprep.subr.bf16.mxu1 %v434_v1  ;;  %400 = vmatprep.mubr.msk.bf16.mxu1 %vm435_vm0, %v434_v1  ;;  %v410_v4 = vld [vmem:[%s544_s2 + $0x70] sm:$0xff]   ;;  %v412_v6 = vld [vmem:[%s544_s2 + $0x68] sm:$0xff]   ;;  %vm221_vm2 = vcmask 769024   ;;  %vm321_vm3 = vcmask 797696   ;;  %vm323_vm4 = vcmask 796672  }
   0x2   :  { %v409_v2 = vld [vmem:[%s544_s2 + $0x38] sm:$0xff]   ;;  %407 = vset.pattern.permute.xlu0 %v436_v3  ;;  %359 = vmatprep.subr.bf16.mxu0 %v408_v0  ;;  %v411_v5 = vld [vmem:[%s544_s2 + $0x30] sm:$0xff]   ;;  %v414_v7 = vld [vmem:[%s544_s2 + $0xa8] sm:$0x7f]  }
   0x3   :  { %360 = vmatpush3.bf16.msra.mxu0 %v409_v2  ;;  %v413_v8 = vld [vmem:[%s544_s2 + $0x28] sm:$0xff]   ;;  %v227_v9 = vsel %vm225_vm1, %v414_v7, 0  ;;  %v415_v10 = vld [vmem:[%s544_s2 + $0x60] sm:$0xff]   ;;  %v418_v13 = vld [vmem:[%s544_s2 + $0x58] sm:$0xff]  }
   0x4   :  { %361 = vmatprep.subr.bf16.mxu0 %v410_v4  ;;  %389 = vmatpush3.bf16.msra.mxu1 %v227_v9  ;;  %v417_v11 = vld [vmem:[%s544_s2 + $0xa0] sm:$0xff]   ;;  %v420_v14 = vld [vmem:[%s544_s2 + $0x98] sm:$0xff]   ;;  %v421_v16 = vld [vmem:[%s544_s2 + $0x50] sm:$0xff]  }
   0x5   :  { %390 = vmatprep.subr.bf16.mxu1 %v434_v1  ;;  %v416_v12 = vld [vmem:[%s544_s2 + $0x20] sm:$0xff]   ;;  %v419_v15 = vld [vmem:[%s544_s2 + $0x18] sm:$0xff]   ;;  %v423_v17 = vld [vmem:[%s544_s2 + $0x90] sm:$0xff]  }
   0x6   :  { %v422_v18 = vld [vmem:[%s544_s2 + $0x10] sm:$0xff]   ;;  %v424_v19 = vld [vmem:[%s544_s2 + $0x48] sm:$0xff]   ;;  %v63_v23 = vld [vmem:[%s546_s1] sm:$0xff] }
   0x7   :  { %362 = vmatpush3.bf16.msra.mxu0 %v411_v5  ;;  %v426_v20 = vld [vmem:[%s544_s2 + $0x88] sm:$0xff]   ;;  %v432_v22 = vld [vmem:[%s545_s0 + $0x4] ss:$12 sps:$4 sm:$0x7f]   ;;  %67 = vperm.xlu0 %407, %v63_v23  }
   0x8   :  { %363 = vmatprep.subr.bf16.mxu0 %v412_v6  ;;  %391 = vmatpush3.bf16.msra.mxu1 %v417_v11  ;;  %v425_v21 = vld [vmem:[%s544_s2 + $0x8] sm:$0xff]   ;;  %v427_v24 = vld [vmem:[%s544_s2 + $0x40] sm:$0xff]  }
   0x9   :  { %392 = vmatprep.subr.bf16.mxu1 %v434_v1  ;;  %v429_v25 = vld [vmem:[%s544_s2 + $0x80] sm:$0xff]   ;;  %261 = vmatprep.mubr.bf16.mxu0 %v432_v22  ;;  %v64_v26 = vld [vmem:[%s546_s1 + $0x8] sm:$0x3f] }
   0xa   :  { %v428_v27 = vld [vmem:[%s544_s2] sm:$0xff]   ;;  %v433_v28 = vld [vmem:[%s545_s0 + $0x8] ss:$12 sps:$4 sm:$0x7f]  }
   0xb   :  { %364 = vmatpush3.bf16.msra.mxu0 %v413_v8  ;;  %72 = vperm.xlu0 %407, %v64_v26   ;;  %v430_v29 = vld [vmem:[%s545_s0] ss:$12 sps:$4 sm:$0x7f]  }
   0xc   :  { %365 = vmatprep.subr.bf16.mxu0 %v415_v10  ;;  %393 = vmatpush3.bf16.msra.mxu1 %v420_v14 }
   0xd   :  { %394 = vmatprep.subr.bf16.mxu1 %v434_v1 }
   0xf   :  { %366 = vmatpush3.bf16.msra.mxu0 %v416_v12 }
  0x10   :  { %367 = vmatprep.subr.bf16.mxu0 %v418_v13  ;;  %395 = vmatpush3.bf16.msra.mxu1 %v423_v17 }
  0x11   :  { %396 = vmatprep.subr.bf16.mxu1 %v434_v1 }
  0x13   :  { %368 = vmatpush3.bf16.msra.mxu0 %v419_v15 }
  0x14   :  { %369 = vmatprep.subr.bf16.mxu0 %v421_v16  ;;  %397 = vmatpush3.bf16.msra.mxu1 %v426_v20 }
  0x15   :  { %398 = vmatprep.subr.bf16.mxu1 %v434_v1 }
  0x17   :  { %370 = vmatpush3.bf16.msra.mxu0 %v422_v18 }
  0x18   :  { %371 = vmatprep.subr.bf16.mxu0 %v424_v19  ;;  %399 = vmatpush3.bf16.msra.mxu1 %v429_v25 }
  0x1b   :  { %372 = vmatpush3.bf16.msra.mxu0 %v425_v21  ;;  %401 = vmatmul.mubr.msk.bf16.vlgmr.msra.gmra.mxu1 %vm221_vm2, %v433_v28 }
  0x1c   :  { %373 = vmatprep.subr.bf16.mxu0 %v427_v24 }
  0x1f   :  { %374 = vmatpush3.bf16.msra.mxu0 %v428_v27 }
  0x22   :  { %262 = vmatmul.mubr.bf16.vlgmr.msra.gmra.mxu0 %v430_v29 }
  0x82   :  { %v68_v33 = vpop.permute.xlu0 %67 }
  0x86   :  { %v73_v43 = vpop.permute.xlu0 %72 }
  0xdb   :  { %v304_v30 = vpop.f32.mrf.mxu1 }
  0xdd   :  { %v402_v32 = vpop.f32.mrf.mxu1 }
  0xdf   :  { %v307_v35 = vpop.f32.mrf.mxu1 }
  0xe1   :  { %v403_v38 = vpop.f32.mrf.mxu1 }
  0xe2   :  { %v375_v31 = vpop.f32.mrf.mxu0 }
  0xe4   :  { %v376_v34 = vpop.f32.mrf.mxu0 }
  0xe5   :  { %v377_v36 = vadd.f32 %v376_v34, %v375_v31 }
  0xe6   :  { %v378_v37 = vpop.f32.mrf.mxu0 }
  0xe7   :  { %v264_v39 = vadd.f32 %v377_v36, %v68_v33 }
  0xe8   :  { %v379_v40 = vpop.f32.mrf.mxu0 }
  0xe9   :  { %v305_v41 = vadd.f32 %v304_v30, %v264_v39  ;;  %v380_v42 = vadd.f32 %v379_v40, %v378_v37 }
  0xeb   :  { %v311_v44 = vmax.f32 %v305_v41, 0.0  ;;  %v267_v45 = vadd.f32 %v380_v42, %v73_v43 }
  0xed   :  { %v357_v46 = vpack.c.bf16 %v311_v44, %v311_v44  ;;  %v308_v47 = vadd.f32 %v307_v35, %v267_v45 }
  0xef   :  { %322 = vst.msk [vmem:[%s547_s3] sm:$0xf] %vm321_vm3, %v357_v46  ;;  %v312_v48 = vmax.f32 %v308_v47, 0.0 }
  0xf1   :  { %v358_v49 = vpack.c.bf16 %v312_v48, %v312_v48 }
  0xf3   :  { %324 = vst.msk [vmem:[%s547_s3 + $0x4] sm:$0x7] %vm323_vm4, %v358_v49 }

// kernel: _lambda_.6
= control target key start
LH: loop header
LB: loop body
LE: loop exit
PB: predicated region body
PF: predicated region fallthrough
CT: control target
= control target key end

     0   :  { %v422_v1 = vmov 0.0   ;;  %vm423_vm0 = vmmov 0   ;;  %v424_v3 = vmov 0   ;;  %vm225_vm1 = vcmask 1046528   ;;  %s532_s2 = inlined_call_operand.vmem [shape: bf16[350,32], index: 2, kind: input, shape index: {}]   ;;  %s533_s0 = inlined_call_operand.vmem [shape: bf16[12,350], index: 0, kind: input, shape index: {}]   ;;  %s534_s1 = inlined_call_operand.vmem [shape: f32[12,1], index: 1, kind: input, shape index: {}]   ;;  %s535_s3 = inlined_call_operand.vmem [shape: f32[12,32], index: 3, kind: output, shape index: {}]  }
   0x1   :  { %v396_v0 = vld [vmem:[%s532_s2 + $0x78] sm:$0xff]   ;;  %376 = vmatprep.subr.bf16.mxu1 %v422_v1  ;;  %388 = vmatprep.mubr.msk.bf16.mxu1 %vm423_vm0, %v422_v1  ;;  %v398_v4 = vld [vmem:[%s532_s2 + $0x70] sm:$0xff]   ;;  %v400_v6 = vld [vmem:[%s532_s2 + $0x68] sm:$0xff]   ;;  %vm221_vm2 = vcmask 769024   ;;  %vm313_vm3 = vcmask 261120   ;;  %vm315_vm4 = vcmask 257024  }
   0x2   :  { %v397_v2 = vld [vmem:[%s532_s2 + $0x38] sm:$0xff]   ;;  %395 = vset.pattern.permute.xlu0 %v424_v3  ;;  %347 = vmatprep.subr.bf16.mxu0 %v396_v0  ;;  %v399_v5 = vld [vmem:[%s532_s2 + $0x30] sm:$0xff]   ;;  %v402_v7 = vld [vmem:[%s532_s2 + $0xa8] sm:$0x7f]  }
   0x3   :  { %348 = vmatpush3.bf16.msra.mxu0 %v397_v2  ;;  %v401_v8 = vld [vmem:[%s532_s2 + $0x28] sm:$0xff]   ;;  %v227_v9 = vsel %vm225_vm1, %v402_v7, 0  ;;  %v403_v10 = vld [vmem:[%s532_s2 + $0x60] sm:$0xff]   ;;  %v406_v13 = vld [vmem:[%s532_s2 + $0x58] sm:$0xff]  }
   0x4   :  { %349 = vmatprep.subr.bf16.mxu0 %v398_v4  ;;  %377 = vmatpush3.bf16.msra.mxu1 %v227_v9  ;;  %v405_v11 = vld [vmem:[%s532_s2 + $0xa0] sm:$0xff]   ;;  %v408_v14 = vld [vmem:[%s532_s2 + $0x98] sm:$0xff]   ;;  %v409_v16 = vld [vmem:[%s532_s2 + $0x50] sm:$0xff]  }
   0x5   :  { %378 = vmatprep.subr.bf16.mxu1 %v422_v1  ;;  %v404_v12 = vld [vmem:[%s532_s2 + $0x20] sm:$0xff]   ;;  %v407_v15 = vld [vmem:[%s532_s2 + $0x18] sm:$0xff]   ;;  %v411_v17 = vld [vmem:[%s532_s2 + $0x90] sm:$0xff]  }
   0x6   :  { %v410_v18 = vld [vmem:[%s532_s2 + $0x10] sm:$0xff]   ;;  %v412_v19 = vld [vmem:[%s532_s2 + $0x48] sm:$0xff]   ;;  %v63_v23 = vld [vmem:[%s534_s1] sm:$0xff] }
   0x7   :  { %350 = vmatpush3.bf16.msra.mxu0 %v399_v5  ;;  %v414_v20 = vld [vmem:[%s532_s2 + $0x88] sm:$0xff]   ;;  %v420_v22 = vld [vmem:[%s533_s0 + $0x4] ss:$12 sps:$4 sm:$0x3f]   ;;  %67 = vperm.xlu0 %395, %v63_v23  }
   0x8   :  { %351 = vmatprep.subr.bf16.mxu0 %v400_v6  ;;  %379 = vmatpush3.bf16.msra.mxu1 %v405_v11  ;;  %v413_v21 = vld [vmem:[%s532_s2 + $0x8] sm:$0xff]   ;;  %v415_v24 = vld [vmem:[%s532_s2 + $0x40] sm:$0xff]  }
   0x9   :  { %380 = vmatprep.subr.bf16.mxu1 %v422_v1  ;;  %v417_v25 = vld [vmem:[%s532_s2 + $0x80] sm:$0xff]   ;;  %261 = vmatprep.mubr.bf16.mxu0 %v420_v22  ;;  %v64_v26 = vld [vmem:[%s534_s1 + $0x8] sm:$0xf] }
   0xa   :  { %v416_v27 = vld [vmem:[%s532_s2] sm:$0xff]   ;;  %v421_v28 = vld [vmem:[%s533_s0 + $0x8] ss:$12 sps:$4 sm:$0x3f]  }
   0xb   :  { %352 = vmatpush3.bf16.msra.mxu0 %v401_v8  ;;  %72 = vperm.xlu0 %395, %v64_v26   ;;  %v418_v29 = vld [vmem:[%s533_s0] ss:$12 sps:$4 sm:$0x3f]  }
   0xc   :  { %353 = vmatprep.subr.bf16.mxu0 %v403_v10  ;;  %381 = vmatpush3.bf16.msra.mxu1 %v408_v14 }
   0xd   :  { %382 = vmatprep.subr.bf16.mxu1 %v422_v1 }
   0xf   :  { %354 = vmatpush3.bf16.msra.mxu0 %v404_v12 }
  0x10   :  { %355 = vmatprep.subr.bf16.mxu0 %v406_v13  ;;  %383 = vmatpush3.bf16.msra.mxu1 %v411_v17 }
  0x11   :  { %384 = vmatprep.subr.bf16.mxu1 %v422_v1 }
  0x13   :  { %356 = vmatpush3.bf16.msra.mxu0 %v407_v15 }
  0x14   :  { %357 = vmatprep.subr.bf16.mxu0 %v409_v16  ;;  %385 = vmatpush3.bf16.msra.mxu1 %v414_v20 }
  0x15   :  { %386 = vmatprep.subr.bf16.mxu1 %v422_v1 }
  0x17   :  { %358 = vmatpush3.bf16.msra.mxu0 %v410_v18 }
  0x18   :  { %359 = vmatprep.subr.bf16.mxu0 %v412_v19  ;;  %387 = vmatpush3.bf16.msra.mxu1 %v417_v25 }
  0x1b   :  { %360 = vmatpush3.bf16.msra.mxu0 %v413_v21  ;;  %389 = vmatmul.mubr.msk.bf16.vlgmr.msra.gmra.mxu1 %vm221_vm2, %v421_v28 }
  0x1c   :  { %361 = vmatprep.subr.bf16.mxu0 %v415_v24 }
  0x1f   :  { %362 = vmatpush3.bf16.msra.mxu0 %v416_v27 }
  0x22   :  { %262 = vmatmul.mubr.bf16.vlgmr.msra.gmra.mxu0 %v418_v29 }
  0x82   :  { %v68_v33 = vpop.permute.xlu0 %67 }
  0x86   :  { %v73_v43 = vpop.permute.xlu0 %72 }
  0xdb   :  { %v304_v30 = vpop.f32.mrf.mxu1 }
  0xdd   :  { %v390_v32 = vpop.f32.mrf.mxu1 }
  0xdf   :  { %v307_v35 = vpop.f32.mrf.mxu1 }
  0xe1   :  { %v391_v38 = vpop.f32.mrf.mxu1 }
  0xe2   :  { %v363_v31 = vpop.f32.mrf.mxu0 }
  0xe4   :  { %v364_v34 = vpop.f32.mrf.mxu0 }
  0xe5   :  { %v365_v36 = vadd.f32 %v364_v34, %v363_v31 }
  0xe6   :  { %v366_v37 = vpop.f32.mrf.mxu0 }
  0xe7   :  { %v264_v39 = vadd.f32 %v365_v36, %v68_v33 }
  0xe8   :  { %v367_v40 = vpop.f32.mrf.mxu0 }
  0xe9   :  { %v305_v41 = vadd.f32 %v304_v30, %v264_v39  ;;  %v368_v42 = vadd.f32 %v367_v40, %v366_v37 }
  0xeb   :  { %v311_v44 = vmax.f32 %v305_v41, 0.0  ;;  %v267_v45 = vadd.f32 %v368_v42, %v73_v43 }
  0xed   :  { %314 = vst.msk [vmem:[%s535_s3] sm:$0xff] %vm313_vm3, %v311_v44  ;;  %v308_v46 = vadd.f32 %v307_v35, %v267_v45 }
  0xef   :  { %v312_v47 = vmax.f32 %v308_v46, 0.0 }
  0xf1   :  { %316 = vst.msk [vmem:[%s535_s3 + $0x8] sm:$0xf] %vm315_vm4, %v312_v47 }

// kernel: _lambda_.7
= control target key start
LH: loop header
LB: loop body
LE: loop exit
PB: predicated region body
PF: predicated region fallthrough
CT: control target
= control target key end

     0   :  { %v875_v0 = vmov 0   ;;  %vm572_vm0 = vcmask 97280   ;;  %vm579_vm1 = vcmask 1043456   ;;  %vm662_vm2 = vcmask 9216   ;;  %s1247_s1 = inlined_call_operand.vmem [shape: f32[20,12,1], index: 1, kind: input, shape index: {}]   ;;  %s1248_s3 = inlined_call_operand.vmem [shape: f32[10,1], index: 3, kind: input, shape index: {}]   ;;  %s1249_s2 = inlined_call_operand.vmem [shape: f32[10,12], index: 2, kind: input, shape index: {}]   ;;  %s1250_s0 = inlined_call_operand.vmem [shape: f32[12,2], index: 0, kind: input, shape index: {}]   ;;  %s1251_s4 = inlined_call_operand.vmem [shape: f32[10,2], index: 4, kind: output, shape index: {}]  }
   0x1   :  { %786 = vset.pattern.permute.xlu1 %v875_v0  ;;  %785 = vset.pattern.permute.xlu0 %v875_v0  ;;  %v22_v1 = vld [vmem:[%s1247_s1 + $0x8] sm:$0xf]  ;;  %v21_v2 = vld [vmem:[%s1247_s1] sm:$0xff]  ;;  %v697_v3 = vld [vmem:[%s1247_s1 + $0x18] sm:$0xf]  ;;  %vm658_vm3 = vcmask 15360  }
   0x2   :  { %38 = vperm.xlu0 %785, %v22_v1   ;;  %33 = vperm.xlu1 %786, %v21_v2   ;;  %v696_v4 = vld [vmem:[%s1247_s1 + $0x10] sm:$0xff]  ;;  %v701_v5 = vld [vmem:[%s1247_s1 + $0x28] sm:$0xf]  ;;  %v700_v6 = vld [vmem:[%s1247_s1 + $0x20] sm:$0xff] }
   0x3   :  { %v705_v7 = vld [vmem:[%s1247_s1 + $0x38] sm:$0xf]  ;;  %v704_v8 = vld [vmem:[%s1247_s1 + $0x30] sm:$0xff]  ;;  %v709_v9 = vld [vmem:[%s1247_s1 + $0x48] sm:$0xf] }
   0x4   :  { %v708_v10 = vld [vmem:[%s1247_s1 + $0x40] sm:$0xff]  ;;  %v713_v11 = vld [vmem:[%s1247_s1 + $0x58] sm:$0xf]  ;;  %v712_v12 = vld [vmem:[%s1247_s1 + $0x50] sm:$0xff] }
   0x5   :  { %v717_v13 = vld [vmem:[%s1247_s1 + $0x68] sm:$0xf]  ;;  %v716_v14 = vld [vmem:[%s1247_s1 + $0x60] sm:$0xff]  ;;  %v721_v15 = vld [vmem:[%s1247_s1 + $0x78] sm:$0xf] }
   0x6   :  { %65 = vperm.xlu0 %785, %v697_v3   ;;  %60 = vperm.xlu1 %786, %v696_v4   ;;  %v720_v16 = vld [vmem:[%s1247_s1 + $0x70] sm:$0xff]  ;;  %v725_v17 = vld [vmem:[%s1247_s1 + $0x88] sm:$0xf]  ;;  %v724_v18 = vld [vmem:[%s1247_s1 + $0x80] sm:$0xff] }
   0x7   :  { %v729_v19 = vld [vmem:[%s1247_s1 + $0x98] sm:$0xf]  ;;  %v728_v20 = vld [vmem:[%s1247_s1 + $0x90] sm:$0xff]  ;;  %v733_v21 = vld [vmem:[%s1247_s1 + $0xa8] sm:$0xf] }
   0x8   :  { %v732_v22 = vld [vmem:[%s1247_s1 + $0xa0] sm:$0xff]  ;;  %v737_v23 = vld [vmem:[%s1247_s1 + $0xb8] sm:$0xf]  ;;  %v736_v24 = vld [vmem:[%s1247_s1 + $0xb0] sm:$0xff] }
   0x9   :  { %v741_v25 = vld [vmem:[%s1247_s1 + $0xc8] sm:$0xf]  ;;  %v740_v26 = vld [vmem:[%s1247_s1 + $0xc0] sm:$0xff]  ;;  %v745_v27 = vld [vmem:[%s1247_s1 + $0xd8] sm:$0xf] }
   0xa   :  { %92 = vperm.xlu0 %785, %v701_v5   ;;  %87 = vperm.xlu1 %786, %v700_v6   ;;  %v744_v28 = vld [vmem:[%s1247_s1 + $0xd0] sm:$0xff]  ;;  %v749_v29 = vld [vmem:[%s1247_s1 + $0xe8] sm:$0xf]  ;;  %v748_v30 = vld [vmem:[%s1247_s1 + $0xe0] sm:$0xff] }
   0xb   :  { %v753_v31 = vld [vmem:[%s1247_s1 + $0xf8] sm:$0xf]  ;;  %v752_v32 = vld [vmem:[%s1247_s1 + $0xf0] sm:$0xff]  ;;  %v757_v33 = vld [vmem:[%s1247_s1 + $0x108] sm:$0xf] }
   0xc   :  { %v756_v34 = vld [vmem:[%s1247_s1 + $0x100] sm:$0xff]  ;;  %v761_v35 = vld [vmem:[%s1247_s1 + $0x118] sm:$0xf]  ;;  %v760_v36 = vld [vmem:[%s1247_s1 + $0x110] sm:$0xff] }
   0xd   :  { %v765_v37 = vld [vmem:[%s1247_s1 + $0x128] sm:$0xf]  ;;  %v764_v38 = vld [vmem:[%s1247_s1 + $0x120] sm:$0xff]  ;;  %v769_v39 = vld [vmem:[%s1247_s1 + $0x138] sm:$0xf] }
   0xe   :  { %119 = vperm.xlu0 %785, %v705_v7   ;;  %114 = vperm.xlu1 %786, %v704_v8   ;;  %v768_v40 = vld [vmem:[%s1247_s1 + $0x130] sm:$0xff]  ;;  %v560_v41 = vld [vmem:[%s1248_s3] sm:$0xff]  ;;  %v561_v42 = vld [vmem:[%s1248_s3 + $0x8] sm:$0x3] }
   0xf   :  { %v558_v43 = vld [vmem:[%s1249_s2] sm:$0xff]  ;;  %v1034_v44 = vld [vmem:[%s1250_s0 + $0x8] sm:$0xf] }
  0x10   :  { %781 = vmatprep.mubr.msk.f32.mxu0 %vm572_vm0, %v558_v43  ;;  %v1039_v45 = vld [vmem:[%s1250_s0] sm:$0xff]  ;;  %v693_v46 = vadd.f32 4.0, %v1034_v44  ;;  %v695_v48 = vadd.f32 3.5789473, %v1034_v44  ;;  %v699_v50 = vadd.f32 3.1578948, %v1034_v44 }
  0x11   :  { %v692_v47 = vadd.f32 4.0, %v1039_v45  ;;  %v694_v49 = vadd.f32 3.5789473, %v1039_v45  ;;  %v698_v51 = vadd.f32 3.1578948, %v1039_v45 }
  0x12   :  { %146 = vperm.xlu0 %785, %v709_v9   ;;  %141 = vperm.xlu1 %786, %v708_v10   ;;  %v24_v52 = vmul.f32 -0.7050781, %v693_v46  ;;  %v51_v54 = vmul.f32 -0.7050781, %v695_v48  ;;  %v703_v55 = vadd.f32 2.7368422, %v1034_v44  ;;  %v78_v57 = vmul.f32 -0.7050781, %v699_v50 }
  0x13   :  { %v23_v53 = vmul.f32 -0.7050781, %v692_v47  ;;  %v50_v56 = vmul.f32 -0.7050781, %v694_v49  ;;  %v77_v58 = vmul.f32 -0.7050781, %v698_v51  ;;  %v702_v59 = vadd.f32 2.7368422, %v1039_v45 }
  0x14   :  { %v26_v60 = vmul.f32 %v693_v46, %v24_v52  ;;  %v707_v61 = vadd.f32 2.3157895, %v1034_v44  ;;  %v53_v63 = vmul.f32 %v695_v48, %v51_v54  ;;  %v105_v0 = vmul.f32 -0.7050781, %v703_v55 }
  0x15   :  { %v25_v62 = vmul.f32 %v692_v47, %v23_v53  ;;  %v706_v1 = vadd.f32 2.3157895, %v1039_v45  ;;  %v52_v4 = vmul.f32 %v694_v49, %v50_v56  ;;  %v711_v5 = vadd.f32 1.8947369, %v1034_v44 }
  0x16   :  { %173 = vperm.xlu0 %785, %v713_v11   ;;  %168 = vperm.xlu1 %786, %v712_v12   ;;  %v80_v6 = vmul.f32 %v699_v50, %v78_v57  ;;  %v79_v7 = vmul.f32 %v698_v51, %v77_v58  ;;  %v104_v8 = vmul.f32 -0.7050781, %v702_v59  ;;  %v710_v9 = vadd.f32 1.8947369, %v1039_v45 }
  0x17   :  { %v29_v10 = vmul.f32 1.442695, %v26_v60  ;;  %v132_v11 = vmul.f32 -0.7050781, %v707_v61  ;;  %v715_v12 = vadd.f32 1.4736842, %v1034_v44 }
  0x18   :  { %v727_v47 = vadd.f32 0.21052632, %v1034_v44  ;;  %v731_v58 = vadd.f32 -0.21052632, %v1034_v44 }
  0x19   :  { %787 = vpow2.f32 %v29_v10  ;;  %v739_v10 = vadd.f32 -1.0526316, %v1034_v44 }
  0x1a   :  { %200 = vperm.xlu0 %785, %v717_v13   ;;  %195 = vperm.xlu1 %786, %v716_v14   ;;  %v27_v13 = vmul.f32 1.442695, %v25_v62  ;;  %v56_v14 = vmul.f32 1.442695, %v53_v63  ;;  %v267_v60 = vmul.f32 -0.7050781, %v727_v47 }
  0x1c   :  { %789 = vpow2.f32 %v27_v13  ;;  %v269_v13 = vmul.f32 %v727_v47, %v267_v60  ;;  %v751_v47 = vadd.f32 -2.3157895, %v1034_v44 }
  0x1d   :  { %791 = vpow2.f32 %v56_v14 }
  0x1e   :  { %227 = vperm.xlu0 %785, %v721_v15   ;;  %222 = vperm.xlu1 %786, %v720_v16   ;;  %v107_v15 = vmul.f32 %v703_v55, %v105_v0  ;;  %v131_v16 = vmul.f32 -0.7050781, %v706_v1  ;;  %v726_v55 = vadd.f32 0.21052632, %v1039_v45 }
  0x22   :  { %254 = vperm.xlu0 %785, %v725_v17   ;;  %249 = vperm.xlu1 %786, %v724_v18  }
  0x26   :  { %281 = vperm.xlu0 %785, %v729_v19   ;;  %276 = vperm.xlu1 %786, %v728_v20   ;;  %v54_v19 = vmul.f32 1.442695, %v52_v4  ;;  %v159_v20 = vmul.f32 -0.7050781, %v711_v5  ;;  %v735_v4 = vadd.f32 -0.6315789, %v1034_v44 }
  0x28   :  { %793 = vpow2.f32 %v54_v19 }
  0x2a   :  { %308 = vperm.xlu0 %785, %v733_v21   ;;  %303 = vperm.xlu1 %786, %v732_v22   ;;  %v714_v21 = vadd.f32 1.4736842, %v1039_v45  ;;  %v83_v22 = vmul.f32 1.442695, %v80_v6  ;;  %v266_v6 = vmul.f32 -0.7050781, %v726_v55 }
  0x2c   :  { %795 = vpow2.f32 %v83_v22  ;;  %v321_v22 = vmul.f32 -0.7050781, %v735_v4 }
  0x2e   :  { %335 = vperm.xlu0 %785, %v737_v23   ;;  %330 = vperm.xlu1 %786, %v736_v24   ;;  %v81_v23 = vmul.f32 1.442695, %v79_v7  ;;  %v106_v24 = vmul.f32 %v702_v59, %v104_v8  ;;  %v734_v7 = vadd.f32 -0.6315789, %v1039_v45 }
  0x30   :  { %797 = vpow2.f32 %v81_v23  ;;  %v743_v23 = vadd.f32 -1.4736842, %v1034_v44 }
  0x32   :  { %362 = vperm.xlu0 %785, %v741_v25   ;;  %357 = vperm.xlu1 %786, %v740_v26   ;;  %v158_v25 = vmul.f32 -0.7050781, %v710_v9  ;;  %v134_v26 = vmul.f32 %v707_v61, %v132_v11  ;;  %v730_v61 = vadd.f32 -0.21052632, %v1039_v45  ;;  %v1086_v11 = vpop.eup %787 }
  0x34   :  { %v293_v14 = vmul.f32 -0.7050781, %v730_v61 }
  0x36   :  { %389 = vperm.xlu0 %785, %v745_v27   ;;  %384 = vperm.xlu1 %786, %v744_v28   ;;  %v186_v27 = vmul.f32 -0.7050781, %v715_v12  ;;  %v719_v28 = vadd.f32 1.0526316, %v1034_v44 }
  0x3a   :  { %416 = vperm.xlu0 %785, %v749_v29   ;;  %411 = vperm.xlu1 %786, %v748_v30   ;;  %v110_v29 = vmul.f32 1.442695, %v107_v15  ;;  %v133_v30 = vmul.f32 %v706_v1, %v131_v16  ;;  %v738_v15 = vadd.f32 -1.0526316, %v1039_v45  ;;  %v1089_v16 = vpop.eup %789 }
  0x3c   :  { %v135_v43 = vmul.f32 1.442695, %v133_v30  ;;  %799 = vpow2.f32 %v110_v29 }
  0x3e   :  { %443 = vperm.xlu0 %785, %v753_v31   ;;  %438 = vperm.xlu1 %786, %v752_v32   ;;  %v718_v31 = vadd.f32 1.0526316, %v1039_v45 }
  0x40   :  { %v212_v46 = vmul.f32 -0.7050781, %v718_v31 }
  0x42   :  { %470 = vperm.xlu0 %785, %v757_v33   ;;  %465 = vperm.xlu1 %786, %v756_v34   ;;  %v161_v34 = vmul.f32 %v711_v5, %v159_v20  ;;  %v214_v59 = vmul.f32 %v718_v31, %v212_v46  ;;  %v348_v31 = vmul.f32 -0.7050781, %v739_v10  ;;  %v375_v46 = vmul.f32 -0.7050781, %v743_v23 }
  0x44   :  { %v164_v50 = vmul.f32 1.442695, %v161_v34  ;;  %v747_v34 = vadd.f32 -1.8947369, %v1034_v44 }
  0x46   :  { %497 = vperm.xlu0 %785, %v761_v35   ;;  %492 = vperm.xlu1 %786, %v760_v36   ;;  %v185_v35 = vmul.f32 -0.7050781, %v714_v21  ;;  %v723_v36 = vadd.f32 0.6315789, %v1034_v44 }
  0x48   :  { %v187_v51 = vmul.f32 %v714_v21, %v185_v35  ;;  %v240_v52 = vmul.f32 -0.7050781, %v723_v36 }
  0x4a   :  { %524 = vperm.xlu0 %785, %v765_v37   ;;  %519 = vperm.xlu1 %786, %v764_v38   ;;  %v108_v37 = vmul.f32 1.442695, %v106_v24  ;;  %v160_v38 = vmul.f32 %v710_v9, %v158_v25  ;;  %v189_v0 = vmul.f32 1.442695, %v187_v51  ;;  %v242_v1 = vmul.f32 %v723_v36, %v240_v52  ;;  %v1096_v24 = vpop.eup %791 }
  0x4b   :  { %v294_v9 = vmul.f32 -0.7050781, %v731_v58  ;;  %v1099_v29 = vpop.eup %793  ;;  %v272_v36 = vmul.f32 1.442695, %v269_v13  ;;  %v755_v13 = vadd.f32 -2.7368422, %v1034_v44 }
  0x4c   :  { %801 = vpow2.f32 %v108_v37  ;;  %v162_v53 = vmul.f32 1.442695, %v160_v38  ;;  %v245_v21 = vmul.f32 1.442695, %v242_v1  ;;  %v1102_v35 = vpop.eup %795  ;;  %v295_v37 = vmul.f32 %v730_v61, %v293_v14 }
  0x4d   :  { %v296_v30 = vmul.f32 %v731_v58, %v294_v9  ;;  %v347_v38 = vmul.f32 -0.7050781, %v738_v15  ;;  %v750_v58 = vadd.f32 -2.3157895, %v1039_v45 }
  0x4e   :  { %551 = vperm.xlu0 %785, %v769_v39   ;;  %546 = vperm.xlu1 %786, %v768_v40   ;;  %v722_v39 = vadd.f32 0.6315789, %v1039_v45  ;;  %v137_v40 = vmul.f32 1.442695, %v134_v26  ;;  %v268_v26 = vmul.f32 %v726_v55, %v266_v6  ;;  %v297_v60 = vmul.f32 1.442695, %v295_v37 }
  0x4f   :  { %v299_v55 = vmul.f32 1.442695, %v296_v30  ;;  %v349_v61 = vmul.f32 %v738_v15, %v347_v38 }
  0x50   :  { %v239_v54 = vmul.f32 -0.7050781, %v722_v39  ;;  %803 = vpow2.f32 %v137_v40  ;;  %v1105_v40 = vpop.eup %797  ;;  %v270_v51 = vmul.f32 1.442695, %v268_v26 }
  0x51   :  { %805 = vpow2.f32 %v135_v43  ;;  %v323_v43 = vmul.f32 %v735_v4, %v321_v22  ;;  %v428_v22 = vmul.f32 -0.7050781, %v750_v58  ;;  %v351_v26 = vmul.f32 1.442695, %v349_v61 }
  0x52   :  { %564 = vperm.xlu0 %785, %v560_v41   ;;  %569 = vperm.xlu1 %786, %v561_v42   ;;  %v188_v41 = vmul.f32 %v715_v12, %v186_v27  ;;  %v213_v42 = vmul.f32 -0.7050781, %v719_v28  ;;  %807 = vpow2.f32 %v164_v50  ;;  %v241_v5 = vmul.f32 %v722_v39, %v239_v54  ;;  %v1112_v50 = vpop.eup %799 }
  0x53   :  { %809 = vpow2.f32 %v162_v53  ;;  %v216_v12 = vmul.f32 1.442695, %v214_v59  ;;  %v320_v27 = vmul.f32 -0.7050781, %v734_v7  ;;  %v746_v39 = vadd.f32 -1.8947369, %v1039_v45 }
  0x54   :  { %v191_v56 = vmul.f32 1.442695, %v188_v41  ;;  %v215_v57 = vmul.f32 %v719_v28, %v213_v42  ;;  %v243_v25 = vmul.f32 1.442695, %v241_v5  ;;  %v742_v28 = vadd.f32 -1.4736842, %v1039_v45 }
  0x55   :  { %v322_v52 = vmul.f32 %v734_v7, %v320_v27  ;;  %v326_v6 = vmul.f32 1.442695, %v323_v43  ;;  %v377_v7 = vmul.f32 %v743_v23, %v375_v46  ;;  %v430_v46 = vmul.f32 %v750_v58, %v428_v22 }
  0x56   :  { %811 = vpow2.f32 %v191_v56  ;;  %v218_v8 = vmul.f32 1.442695, %v215_v57  ;;  %v374_v53 = vmul.f32 -0.7050781, %v742_v28  ;;  %v350_v56 = vmul.f32 %v739_v10, %v348_v31 }
  0x57   :  { %813 = vpow2.f32 %v189_v0  ;;  %v402_v57 = vmul.f32 -0.7050781, %v747_v34  ;;  %v401_v0 = vmul.f32 -0.7050781, %v746_v39  ;;  %v324_v10 = vmul.f32 1.442695, %v322_v52 }
  0x58   :  { %815 = vpow2.f32 %v218_v8  ;;  %v429_v8 = vmul.f32 -0.7050781, %v751_v47  ;;  %v353_v15 = vmul.f32 1.442695, %v350_v56  ;;  %v380_v31 = vmul.f32 1.442695, %v377_v7 }
  0x59   :  { %817 = vpow2.f32 %v216_v12  ;;  %v1114_v54 = vpop.eup %801  ;;  %v376_v12 = vmul.f32 %v742_v28, %v374_v53  ;;  %v403_v27 = vmul.f32 %v746_v39, %v401_v0  ;;  %v432_v0 = vmul.f32 1.442695, %v430_v46 }
  0x5a   :  { %819 = vpow2.f32 %v245_v21  ;;  %v404_v21 = vmul.f32 %v747_v34, %v402_v57  ;;  %v431_v28 = vmul.f32 %v751_v47, %v429_v8  ;;  %v456_v34 = vmul.f32 -0.7050781, %v755_v13 }
  0x5b   :  { %821 = vpow2.f32 %v243_v25  ;;  %v378_v38 = vmul.f32 1.442695, %v376_v12  ;;  %v405_v52 = vmul.f32 1.442695, %v403_v27  ;;  %v758_v57 = vadd.f32 -3.1578948, %v1039_v45 }
  0x5c   :  { %823 = vpow2.f32 %v272_v36  ;;  %v754_v36 = vadd.f32 -2.7368422, %v1039_v45  ;;  %v407_v43 = vmul.f32 1.442695, %v404_v21  ;;  %v434_v47 = vmul.f32 1.442695, %v431_v28 }
  0x5d   :  { %v1117_v59 = vpop.eup %803  ;;  %825 = vpow2.f32 %v270_v51  ;;  %v759_v51 = vadd.f32 -3.1578948, %v1034_v44  ;;  %v458_v61 = vmul.f32 %v755_v13, %v456_v34  ;;  %v763_v7 = vadd.f32 -3.5789473, %v1034_v44 }
  0x5e   :  { %v1119_v1 = vpop.eup %805  ;;  %827 = vpow2.f32 %v299_v55  ;;  %v455_v56 = vmul.f32 -0.7050781, %v754_v36  ;;  %v482_v13 = vmul.f32 -0.7050781, %v758_v57  ;;  %v762_v22 = vadd.f32 -3.5789473, %v1039_v45 }
  0x5f   :  { %v1125_v9 = vpop.eup %807  ;;  %829 = vpow2.f32 %v297_v60  ;;  %v767_v34 = vadd.f32 -4.0, %v1034_v44 }
  0x60   :  { %v1128_v14 = vpop.eup %809  ;;  %831 = vpow2.f32 %v326_v6  ;;  %v483_v6 = vmul.f32 -0.7050781, %v759_v51  ;;  %v457_v21 = vmul.f32 %v754_v36, %v455_v56  ;;  %v510_v36 = vmul.f32 -0.7050781, %v763_v7 }
  0x61   :  { %833 = vpow2.f32 %v324_v10  ;;  %v484_v44 = vmul.f32 %v758_v57, %v482_v13 }
  0x62   :  { %835 = vpow2.f32 %v353_v15 }
  0x63   :  { %v1130_v25 = vpop.eup %811  ;;  %837 = vpow2.f32 %v351_v26 }
  0x64   :  { %v1137_v37 = vpop.eup %813  ;;  %839 = vpow2.f32 %v380_v31  ;;  %v461_v31 = vmul.f32 1.442695, %v458_v61  ;;  %v512_v61 = vmul.f32 %v763_v7, %v510_v36 }
  0x65   :  { %v1140_v39 = vpop.eup %815  ;;  %841 = vpow2.f32 %v378_v38  ;;  %v485_v38 = vmul.f32 %v759_v51, %v483_v6  ;;  %v459_v51 = vmul.f32 1.442695, %v457_v21 }
  0x66   :  { %v1147_v60 = vpop.eup %817  ;;  %843 = vpow2.f32 %v407_v43 }
  0x67   :  { %v1149_v58 = vpop.eup %819  ;;  %845 = vpow2.f32 %v405_v52  ;;  %v509_v52 = vmul.f32 -0.7050781, %v762_v22 }
  0x68   :  { %v1154_v10 = vpop.eup %821  ;;  %847 = vpow2.f32 %v434_v47  ;;  %v766_v47 = vadd.f32 -4.0, %v1039_v45 }
  0x69   :  { %v1161_v26 = vpop.eup %823  ;;  %849 = vpow2.f32 %v432_v0  ;;  %v537_v0 = vmul.f32 -0.7050781, %v767_v34  ;;  %v511_v13 = vmul.f32 %v762_v22, %v509_v52 }
  0x6a   :  { %v1169_v28 = vpop.eup %825  ;;  %851 = vpow2.f32 %v461_v31 }
  0x6b   :  { %v1172_v43 = vpop.eup %827  ;;  %853 = vpow2.f32 %v459_v51 }
  0x7d   :  { %v1051_v2 = vpop.permute.xlu0 %38  ;;  %v1053_v3 = vpop.permute.xlu1 %33 }
  0x7e   :  { %v42_v27 = vmul.f32 %v1086_v11, %v1051_v2  ;;  %v41_v46 = vmul.f32 %v1089_v16, %v1053_v3  ;;  %v1180_v11 = vpop.eup %829 }
  0x7f   :  { %v1187_v56 = vpop.eup %831 }
  0x81   :  { %v1058_v17 = vpop.permute.xlu0 %65  ;;  %v1060_v18 = vpop.permute.xlu1 %60 }
  0x82   :  { %v69_v8 = vmul.f32 %v1096_v24, %v1058_v17  ;;  %v68_v17 = vmul.f32 %v1099_v29, %v1060_v18 }
  0x84   :  { %v71_v2 = vadd.f32 %v69_v8, %v42_v27  ;;  %v70_v3 = vadd.f32 %v68_v17, %v41_v46  ;;  %v536_v27 = vmul.f32 -0.7050781, %v766_v47 }
  0x85   :  { %v1065_v32 = vpop.permute.xlu0 %92  ;;  %v1067_v33 = vpop.permute.xlu1 %87 }
  0x86   :  { %v96_v24 = vmul.f32 %v1102_v35, %v1065_v32  ;;  %v95_v18 = vmul.f32 %v1105_v40, %v1067_v33  ;;  %v1193_v40 = vpop.eup %833 }
  0x87   :  { %v1195_v57 = vpop.eup %835 }
  0x88   :  { %v98_v16 = vadd.f32 %v96_v24, %v71_v2  ;;  %v97_v6 = vadd.f32 %v95_v18, %v70_v3 }
  0x89   :  { %v1072_v48 = vpop.permute.xlu0 %119  ;;  %v1074_v49 = vpop.permute.xlu1 %114 }
  0x8a   :  { %v123_v32 = vmul.f32 %v1112_v50, %v1072_v48  ;;  %v122_v33 = vmul.f32 %v1114_v54, %v1074_v49  ;;  %v488_v50 = vmul.f32 1.442695, %v485_v38  ;;  %v1201_v49 = vpop.eup %837 }
  0x8b   :  { %v840_v7 = vpop.eup %839 }
  0x8c   :  { %v125_v45 = vadd.f32 %v123_v32, %v98_v16  ;;  %v124_v17 = vadd.f32 %v122_v33, %v97_v6  ;;  %855 = vpow2.f32 %v488_v50 }
  0x8d   :  { %v1079_v62 = vpop.permute.xlu0 %146  ;;  %v1081_v63 = vpop.permute.xlu1 %141 }
  0x8e   :  { %v150_v48 = vmul.f32 %v1117_v59, %v1079_v62  ;;  %v149_v8 = vmul.f32 %v1119_v1, %v1081_v63  ;;  %v486_v59 = vmul.f32 1.442695, %v484_v44  ;;  %v842_v1 = vpop.eup %841 }
  0x8f   :  { %v844_v38 = vpop.eup %843 }
  0x90   :  { %v152_v24 = vadd.f32 %v150_v48, %v125_v45  ;;  %v151_v36 = vadd.f32 %v149_v8, %v124_v17  ;;  %v846_v18 = vpop.eup %845  ;;  %857 = vpow2.f32 %v486_v59 }
  0x91   :  { %v1091_v19 = vpop.permute.xlu0 %173  ;;  %v1093_v20 = vpop.permute.xlu1 %168 }
  0x92   :  { %v177_v21 = vmul.f32 %v1125_v9, %v1091_v19  ;;  %v176_v31 = vmul.f32 %v1128_v14, %v1093_v20  ;;  %v515_v19 = vmul.f32 1.442695, %v512_v61  ;;  %v539_v9 = vmul.f32 %v767_v34, %v537_v0 }
  0x93   :  { %v513_v20 = vmul.f32 1.442695, %v511_v13  ;;  %v538_v14 = vmul.f32 %v766_v47, %v536_v27 }
  0x94   :  { %v179_v46 = vadd.f32 %v177_v21, %v152_v24  ;;  %859 = vpow2.f32 %v515_v19 }
  0x95   :  { %v1107_v41 = vpop.permute.xlu0 %200  ;;  %v1109_v42 = vpop.permute.xlu1 %195  ;;  %861 = vpow2.f32 %v513_v20  ;;  %v540_v48 = vmul.f32 1.442695, %v538_v14 }
  0x96   :  { %v204_v63 = vmul.f32 %v1130_v25, %v1107_v41  ;;  %v203_v22 = vmul.f32 %v1137_v37, %v1109_v42  ;;  %v848_v41 = vpop.eup %847  ;;  %v178_v25 = vadd.f32 %v176_v31, %v151_v36  ;;  %v542_v42 = vmul.f32 1.442695, %v539_v9 }
  0x97   :  { %v850_v37 = vpop.eup %849 }
  0x98   :  { %v206_v44 = vadd.f32 %v204_v63, %v179_v46  ;;  %v205_v3 = vadd.f32 %v203_v22, %v178_v25  ;;  %863 = vpow2.f32 %v542_v42 }
  0x99   :  { %v1121_v4 = vpop.permute.xlu0 %227  ;;  %v1123_v5 = vpop.permute.xlu1 %222  ;;  %865 = vpow2.f32 %v540_v48 }
  0x9a   :  { %v231_v2 = vmul.f32 %v1140_v39, %v1121_v4  ;;  %v230_v34 = vmul.f32 %v1147_v60, %v1123_v5 }
  0x9c   :  { %v233_v4 = vadd.f32 %v231_v2, %v206_v44  ;;  %v232_v50 = vadd.f32 %v230_v34, %v205_v3 }
  0x9d   :  { %v1132_v23 = vpop.permute.xlu0 %254  ;;  %v1134_v30 = vpop.permute.xlu1 %249 }
  0x9e   :  { %v258_v52 = vmul.f32 %v1149_v58, %v1132_v23  ;;  %v257_v39 = vmul.f32 %v1154_v10, %v1134_v30  ;;  %v852_v58 = vpop.eup %851 }
  0x9f   :  { %v854_v6 = vpop.eup %853 }
  0xa0   :  { %v260_v5 = vadd.f32 %v258_v52, %v233_v4  ;;  %v259_v61 = vadd.f32 %v257_v39, %v232_v50  ;;  %v559_v50 = vld [vmem:[%s1249_s2 + $0x8] sm:$0x3] }
  0xa1   :  { %v1142_v53 = vpop.permute.xlu0 %281  ;;  %v1144_v55 = vpop.permute.xlu1 %276 }
  0xa2   :  { %v285_v47 = vmul.f32 %v1161_v26, %v1142_v53  ;;  %v284_v23 = vmul.f32 %v1169_v28, %v1144_v55  ;;  %v856_v28 = vpop.eup %855 }
  0xa4   :  { %v287_v0 = vadd.f32 %v285_v47, %v260_v5  ;;  %v286_v45 = vadd.f32 %v284_v23, %v259_v61 }
  0xa5   :  { %v1156_v12 = vpop.permute.xlu0 %308  ;;  %v1158_v15 = vpop.permute.xlu1 %303 }
  0xa6   :  { %v312_v60 = vmul.f32 %v1172_v43, %v1156_v12  ;;  %v311_v30 = vmul.f32 %v1180_v11, %v1158_v15 }
  0xa8   :  { %v314_v8 = vadd.f32 %v312_v60, %v287_v0  ;;  %v313_v43 = vadd.f32 %v311_v30, %v286_v45 }
  0xa9   :  { %v1182_v29 = vpop.permute.xlu0 %335  ;;  %v1184_v35 = vpop.permute.xlu1 %330 }
  0xaa   :  { %v339_v53 = vmul.f32 %v1187_v56, %v1182_v29  ;;  %v338_v55 = vmul.f32 %v1193_v40, %v1184_v35  ;;  %v858_v29 = vpop.eup %857 }
  0xab   :  { %v860_v31 = vpop.eup %859 }
  0xac   :  { %v341_v21 = vadd.f32 %v339_v53, %v314_v8  ;;  %v340_v56 = vadd.f32 %v338_v55, %v313_v43 }
  0xad   :  { %v363_v54 = vpop.permute.xlu0 %362  ;;  %v358_v62 = vpop.permute.xlu1 %357 }
  0xae   :  { %v366_v12 = vmul.f32 %v1195_v57, %v363_v54  ;;  %v365_v59 = vmul.f32 %v1201_v49, %v358_v62  ;;  %v862_v54 = vpop.eup %861 }
  0xaf   :  { %v864_v62 = vpop.eup %863 }
  0xb0   :  { %v368_v27 = vadd.f32 %v366_v12, %v341_v21  ;;  %v367_v63 = vadd.f32 %v365_v59, %v340_v56 }
  0xb1   :  { %v390_v32 = vpop.permute.xlu0 %389  ;;  %v385_v51 = vpop.permute.xlu1 %384 }
  0xb2   :  { %v393_v15 = vmul.f32 %v840_v7, %v390_v32  ;;  %v392_v17 = vmul.f32 %v842_v1, %v385_v51 }
  0xb4   :  { %v395_v19 = vadd.f32 %v393_v15, %v368_v27  ;;  %v394_v36 = vadd.f32 %v392_v17, %v367_v63 }
  0xb5   :  { %v417_v16 = vpop.permute.xlu0 %416  ;;  %v412_v33 = vpop.permute.xlu1 %411 }
  0xb6   :  { %v420_v24 = vmul.f32 %v844_v38, %v417_v16  ;;  %v419_v9 = vmul.f32 %v846_v18, %v412_v33  ;;  %v866_v38 = vpop.eup %865 }
  0xb8   :  { %v422_v46 = vadd.f32 %v420_v24, %v395_v19  ;;  %v421_v7 = vadd.f32 %v419_v9, %v394_v36 }
  0xb9   :  { %v444_v10 = vpop.permute.xlu0 %443  ;;  %v439_v26 = vpop.permute.xlu1 %438 }
  0xba   :  { %v447_v35 = vmul.f32 %v848_v41, %v444_v10  ;;  %v446_v22 = vmul.f32 %v850_v37, %v439_v26 }
  0xbc   :  { %v449_v2 = vadd.f32 %v447_v35, %v422_v46  ;;  %v448_v51 = vadd.f32 %v446_v22, %v421_v7 }
  0xbd   :  { %v471_v11 = vpop.permute.xlu0 %470  ;;  %v466_v13 = vpop.permute.xlu1 %465 }
  0xbe   :  { %v474_v49 = vmul.f32 %v852_v58, %v471_v11  ;;  %v473_v32 = vmul.f32 %v854_v6, %v466_v13 }
  0xc0   :  { %v476_v25 = vadd.f32 %v474_v49, %v449_v2  ;;  %v475_v41 = vadd.f32 %v473_v32, %v448_v51 }
  0xc1   :  { %v498_v40 = vpop.permute.xlu0 %497  ;;  %v493_v57 = vpop.permute.xlu1 %492 }
  0xc2   :  { %v501_v20 = vmul.f32 %v856_v28, %v498_v40  ;;  %v500_v44 = vmul.f32 %v858_v29, %v493_v57 }
  0xc4   :  { %v503_v34 = vadd.f32 %v501_v20, %v476_v25  ;;  %v502_v4 = vadd.f32 %v500_v44, %v475_v41 }
  0xc5   :  { %v525_v14 = vpop.permute.xlu0 %524  ;;  %v520_v1 = vpop.permute.xlu1 %519 }
  0xc6   :  { %v528_v18 = vmul.f32 %v860_v31, %v525_v14  ;;  %v527_v52 = vmul.f32 %v862_v54, %v520_v1 }
  0xc8   :  { %v530_v37 = vadd.f32 %v528_v18, %v503_v34  ;;  %v529_v16 = vadd.f32 %v527_v52, %v502_v4 }
  0xc9   :  { %v552_v42 = vpop.permute.xlu0 %551  ;;  %v547_v3 = vpop.permute.xlu1 %546 }
  0xca   :  { %v555_v39 = vmul.f32 %v864_v62, %v552_v42  ;;  %v554_v47 = vmul.f32 %v866_v38, %v547_v3 }
  0xcc   :  { %v557_v33 = vadd.f32 %v555_v39, %v530_v37  ;;  %v556_v48 = vadd.f32 %v554_v47, %v529_v16 }
  0xcd   :  { %v570_v5 = vpop.permute.xlu1 %569  ;;  %v565_v58 = vpop.permute.xlu0 %564 }
  0xce   :  { %777 = vmatprep.subr.msk.mxu0 %vm579_vm1, %v557_v33 }
  0xcf   :  { %778 = vmatpush3.msk.msra.mxu0 %vm579_vm1, %v557_v33 }
  0xd0   :  { %779 = vmatprep.subr.mxu0 %v556_v48 }
  0xd1   :  { %780 = vmatpush3.msra.mxu0 %v556_v48 }
  0xd2   :  { %782 = vmatmul.mubr.msk.f32.vlgmr.msra.gmra.mxu0 %vm572_vm0, %v559_v50 }
 0x192   :  { %v783_v23 = vpop.f32.mrf.mxu0 }
 0x193   :  { %v655_v60 = vadd.f32 %v783_v23, %v570_v5 }
 0x194   :  { %v649_v61 = vpop.f32.mrf.mxu0 }
 0x195   :  { %v650_v0 = vadd.f32 %v649_v61, %v565_v58  ;;  %v663_v30 = vsel %vm662_vm2, %v655_v60, -inf }
 0x196   :  { %664 = vmax.xlane.f32.xlu1 %v663_v30 }
 0x197   :  { %v659_v53 = vsel %vm658_vm3, %v650_v0, -inf }
 0x198   :  { %660 = vmax.xlane.f32.xlu0 %v659_v53 }
 0x21f   :  { %v665_v10 = vpop.xlane.xlu1 %664 }
 0x220   :  { %v667_v26 = vsub.f32 %v655_v60, %v665_v10 }
 0x221   :  { %v661_v6 = vpop.xlane.xlu0 %660 }
 0x222   :  { %v666_v45 = vsub.f32 %v650_v0, %v661_v6  ;;  %v670_v8 = vmul.f32 1.442695, %v667_v26 }
 0x224   :  { %v668_v55 = vmul.f32 1.442695, %v666_v45 }
 0x226   :  { %867 = vpow2.f32 %v668_v55 }
 0x227   :  { %869 = vpow2.f32 %v670_v8 }
 0x233   :  { %v868_v12 = vpop.eup %867 }
 0x234   :  { %v672_v28 = vsel %vm658_vm3, %v868_v12, 0.0  ;;  %v870_v43 = vpop.eup %869 }
 0x235   :  { %673 = vadd.xlane.f32.xlu0 %v672_v28  ;;  %v675_v21 = vsel %vm662_vm2, %v870_v43, 0.0 }
 0x239   :  { %676 = vadd.xlane.f32.xlu0 %v675_v21 }
 0x2be   :  { %v674_v59 = vpop.xlane.xlu0 %673 }
 0x2bf   :  { %871 = vlog2.f32 %v674_v59 }
 0x2c2   :  { %v677_v15 = vpop.xlane.xlu0 %676 }
 0x2c3   :  { %873 = vlog2.f32 %v677_v15 }
 0x2cc   :  { %v872_v11 = vpop.eup %871 }
 0x2cd   :  { %v679_v13 = vmul.f32 0.6931472, %v872_v11 }
 0x2cf   :  { %v682_v29 = vadd.f32 %v679_v13, %v661_v6 }
 0x2d0   :  { %v874_v56 = vpop.eup %873 }
 0x2d1   :  { %v684_v27 = vsub.f32 %v650_v0, %v682_v29  ;;  %v681_v17 = vmul.f32 0.6931472, %v874_v56 }
 0x2d3   :  { %686 = vst.msk [vmem:[%s1251_s4] sm:$0xff] %vm658_vm3, %v684_v27  ;;  %v683_v24 = vadd.f32 %v681_v17, %v665_v10 }
 0x2d5   :  { %v685_v31 = vsub.f32 %v655_v60, %v683_v24 }
 0x2d7   :  { %687 = vst.msk [vmem:[%s1251_s4 + $0x8] sm:$0x3] %vm662_vm2, %v685_v31 }

</bundles_post_ra>
